<compile_context>
chip_gen: v5e
topology: v5e:2x2
jax: 0.10.0
libtpu: 0.0.40
codegen_flags: <defaults>
</compile_context>

<pallas_src>
import functools

import jax
import jax.numpy as jnp
from jax.experimental import pallas as pl
from jax.experimental.pallas import tpu as pltpu


def _gelu(y):
    # exact (erf-based) GELU, matching torch.nn.GELU() default
    return 0.5 * y * (1.0 + jax.lax.erf(y * 0.7071067811865476))


def _inorm_gelu(y):
    # InstanceNorm2d (affine=False, eps=1e-5, biased variance) over the flat
    # spatial (lane) axis, with single-pass statistics, followed by GELU.
    hw = y.shape[1]
    inv_hw = 1.0 / hw
    mean = jnp.sum(y, axis=1, keepdims=True) * inv_hw
    mean_sq = jnp.sum(y * y, axis=1, keepdims=True) * inv_hw
    var = mean_sq - mean * mean
    yn = (y - mean) * jax.lax.rsqrt(var + 1e-5)
    return _gelu(yn)


def rb_kernel(x_ref, w1_ref, w2_ref, mask_ref, y_ref, *, width, pad):
    # x_ref:    (1, C, H*W)  one batch element, channels on sublanes, H*W on lanes
    # w*_ref:   (9, C, C)    conv taps, layout [tap = dy*3 + dx, cout, cin]
    # mask_ref: (2, 1, H*W)  column masks: [0] zeros col 0, [1] zeros col W-1
    # y_ref:    (1, C, H*W)  output block
    x = x_ref[0]                                   # (C, HW) f32
    c, hw = x.shape

    zpad = jnp.zeros((c, pad), jnp.float32)        # lane-aligned zero extension

    def conv3x3(inp, w_ref):
        # Zero-extend once; every tap is then a cheap static lane slice.
        ext = jnp.concatenate([zpad, inp, zpad], axis=1)       # (C, HW + 2*pad)
        # Center tap initializes the accumulator (no shift, no mask).
        acc = jnp.dot(w_ref[4], inp, preferred_element_type=jnp.float32)
        for k in range(9):
            if k == 4:
                continue
            dy, dx = k // 3, k % 3
            s = (dy - 1) * width + (dx - 1)
            shifted = ext[:, pad + s:pad + s + hw]             # (C, HW)
            if dx == 0:
                shifted = shifted * mask_ref[0]                # kill wrapped left col
            elif dx == 2:
                shifted = shifted * mask_ref[1]                # kill wrapped right col
            acc = acc + jnp.dot(w_ref[k], shifted,
                                preferred_element_type=jnp.float32)
        return acc                                             # (C, HW) f32

    y1 = _inorm_gelu(conv3x3(x, w1_ref))
    y2 = _inorm_gelu(conv3x3(y1, w2_ref))
    y_ref[0] = (y2 + x).astype(y_ref.dtype)


def rb_forward(x_nchw, w1, w2):
    """RB forward.

    x_nchw: (N, C, H, W) f32 (PyTorch NCHW convention).
    w1, w2: (3, 3, C, C) conv weights in (kh, kw, cin, cout) layout (HWIO).
    """
    N, C, H, W = x_nchw.shape
    HW = H * W
    # Free reshapes only -- no transposes, no spatial padding on the host.
    x_flat = x_nchw.reshape(N, C, HW).astype(jnp.float32)
    # Pack weights as (tap, cout, cin) so the kernel does (Cout,Cin)@(Cin,HW).
    w1p = jnp.transpose(w1.reshape(9, C, C), (0, 2, 1)).astype(jnp.float32)
    w2p = jnp.transpose(w2.reshape(9, C, C), (0, 2, 1)).astype(jnp.float32)

    # Column border masks (tiny constants, folded by XLA).
    col = jnp.arange(HW, dtype=jnp.int32) % W
    masks = jnp.stack([
        (col >= 1).astype(jnp.float32),        # applied to taps with dx == 0
        (col <= W - 2).astype(jnp.float32),    # applied to taps with dx == 2
    ]).reshape(2, 1, HW)

    pad = ((W + 1 + 127) // 128) * 128         # >= W+1 and lane-aligned

    kernel = functools.partial(rb_kernel, width=W, pad=pad)

    # TODO(synk): for production-sized H*W*C (esp. v7x's 64 MiB VMEM), tile over
    # rows with a 2-row halo, accumulate per-channel sum/sumsq across row tiles
    # (two-pass instance norm), and expose the row-tile index as a second
    # "parallel" grid axis so both v7x TensorCores stay busy at small N.
    out_flat = pl.pallas_call(
        kernel,
        out_shape=jax.ShapeDtypeStruct((N, C, HW), jnp.float32),
        grid_spec=pltpu.PrefetchScalarGridSpec(
            num_scalar_prefetch=0,
            grid=(N,),
            in_specs=[
                pl.BlockSpec((1, C, HW), lambda n: (n, 0, 0)),
                pl.BlockSpec((9, C, C), lambda n: (0, 0, 0)),
                pl.BlockSpec((9, C, C), lambda n: (0, 0, 0)),
                pl.BlockSpec((2, 1, HW), lambda n: (0, 0, 0)),
            ],
            out_specs=pl.BlockSpec((1, C, HW), lambda n: (n, 0, 0)),
        ),
        compiler_params=pltpu.CompilerParams(
            dimension_semantics=("parallel",),
            vmem_limit_bytes=32 * 1024 * 1024,
        ),
    )(x_flat, w1p, w2p, masks)
    return out_flat.reshape(N, C, H, W)


def rb_reference(x, w1, w2):
    """Plain-JAX reference (mirrors the PyTorch module)."""
    def basic(z, w):
        y = jax.lax.conv_general_dilated(
            z, w, window_strides=(1, 1), padding="SAME",
            dimension_numbers=("NCHW", "HWIO", "NCHW"))
        mean = jnp.mean(y, axis=(2, 3), keepdims=True)
        var = jnp.mean((y - mean) ** 2, axis=(2, 3), keepdims=True)
        y = (y - mean) * jax.lax.rsqrt(var + 1e-5)
        return jax.nn.gelu(y, approximate=False)
    return basic(basic(x, w1), w2) + x


if __name__ == "__main__":
    N, C, H, W = 2, 4, 16, 16
    key = jax.random.PRNGKey(0)
    kx, k1, k2 = jax.random.split(key, 3)

    x = jax.random.normal(kx, (N, C, H, W), jnp.float32)
    # Conv weights in (kh, kw, cin, cout) layout, deterministic init.
    w1 = 0.1 * jax.random.normal(k1, (3, 3, C, C), jnp.float32)
    w2 = 0.1 * jax.random.normal(k2, (3, 3, C, C), jnp.float32)

    out = rb_forward(x, w1, w2)
    out = jax.block_until_ready(out)

    ref = jax.block_until_ready(rb_reference(x, w1, w2))
    assert out.shape == (N, C, H, W)
    assert jnp.allclose(out, ref, atol=1e-3, rtol=1e-3), float(jnp.abs(out - ref).max())

    print("KERNEL_OK")
</pallas_src>

<mosaic_0001>
module attributes {stable_mosaic.version = 11 : i64} {
  func.func @rb_kernel(%arg0: i32, %arg1: memref<1x4x256xf32, #tpu.memory_space<vmem>>, %arg2: memref<9x4x4xf32, #tpu.memory_space<vmem>>, %arg3: memref<9x4x4xf32, #tpu.memory_space<vmem>>, %arg4: memref<2x1x256xf32, #tpu.memory_space<vmem>>, %arg5: memref<1x4x256xf32, #tpu.memory_space<vmem>>) attributes {dimension_semantics = [#tpu.dimension_semantics<parallel>], iteration_bounds = array<i64: 2>, scalar_prefetch = 0 : i64, scratch_operands = 0 : i64, tpu.core_type = #tpu.core_type<tc>, window_params = [{transform_indices = @transform_0, window_bounds = array<i64: 1, 4, 256>}, {pipeline_mode = #tpu.pipeline_mode<synchronous>, transform_indices = @transform_1, window_bounds = array<i64: 9, 4, 4>}, {pipeline_mode = #tpu.pipeline_mode<synchronous>, transform_indices = @transform_2, window_bounds = array<i64: 9, 4, 4>}, {pipeline_mode = #tpu.pipeline_mode<synchronous>, transform_indices = @transform_3, window_bounds = array<i64: 2, 1, 256>}, {transform_indices = @transform_4, window_bounds = array<i64: 1, 4, 256>}]} {
    %c0 = arith.constant 0 : index
    %c0_0 = arith.constant 0 : index
    %c0_1 = arith.constant 0 : index
    %0 = vector.load %arg1[%c0, %c0_0, %c0_1] : memref<1x4x256xf32, #tpu.memory_space<vmem>>, vector<1x4x256xf32>
    %1 = vector.shape_cast %0 : vector<1x4x256xf32> to vector<4x256xf32>
    %cst = arith.constant 0.000000e+00 : f32
    %2 = vector.broadcast %cst : f32 to vector<4x128xf32>
    %3 = tpu.concatenate %2, %1, %2 in 1 : vector<4x128xf32>, vector<4x256xf32>, vector<4x128xf32> -> vector<4x512xf32>
    %c4 = arith.constant 4 : index
    %c0_2 = arith.constant 0 : index
    %c0_3 = arith.constant 0 : index
    %4 = vector.load %arg2[%c4, %c0_2, %c0_3] : memref<9x4x4xf32, #tpu.memory_space<vmem>>, vector<1x4x4xf32>
    %5 = vector.shape_cast %4 : vector<1x4x4xf32> to vector<4x4xf32>
    %cst_4 = arith.constant dense<0.000000e+00> : vector<4x256xf32>
    %6 = tpu.matmul %5, %1, %cst_4 {dimension_numbers = #tpu.dot_dimension_numbers<[1], [0], [0], [1], [0, 0, 1, 1], [], []>} : vector<4x4xf32>, vector<4x256xf32>, vector<4x256xf32> -> vector<4x256xf32>
    %7 = vector.extract_strided_slice %3 {offsets = [0, 111], sizes = [4, 256], strides = [1, 1]} : vector<4x512xf32> to vector<4x256xf32>
    %c0_5 = arith.constant 0 : index
    %c0_6 = arith.constant 0 : index
    %c0_7 = arith.constant 0 : index
    %8 = vector.load %arg4[%c0_5, %c0_6, %c0_7] : memref<2x1x256xf32, #tpu.memory_space<vmem>>, vector<1x1x256xf32>
    %9 = vector.shape_cast %8 : vector<1x1x256xf32> to vector<1x256xf32>
    %10 = vector.broadcast %9 : vector<1x256xf32> to vector<4x256xf32>
    %11 = arith.mulf %7, %10 : vector<4x256xf32>
    %c0_8 = arith.constant 0 : index
    %c0_9 = arith.constant 0 : index
    %c0_10 = arith.constant 0 : index
    %12 = vector.load %arg2[%c0_8, %c0_9, %c0_10] : memref<9x4x4xf32, #tpu.memory_space<vmem>>, vector<1x4x4xf32>
    %13 = vector.shape_cast %12 : vector<1x4x4xf32> to vector<4x4xf32>
    %cst_11 = arith.constant dense<0.000000e+00> : vector<4x256xf32>
    %14 = tpu.matmul %13, %11, %cst_11 {dimension_numbers = #tpu.dot_dimension_numbers<[1], [0], [0], [1], [0, 0, 1, 1], [], []>} : vector<4x4xf32>, vector<4x256xf32>, vector<4x256xf32> -> vector<4x256xf32>
    %15 = arith.addf %6, %14 : vector<4x256xf32>
    %16 = vector.extract_strided_slice %3 {offsets = [0, 112], sizes = [4, 256], strides = [1, 1]} : vector<4x512xf32> to vector<4x256xf32>
    %c1 = arith.constant 1 : index
    %c0_12 = arith.constant 0 : index
    %c0_13 = arith.constant 0 : index
    %17 = vector.load %arg2[%c1, %c0_12, %c0_13] : memref<9x4x4xf32, #tpu.memory_space<vmem>>, vector<1x4x4xf32>
    %18 = vector.shape_cast %17 : vector<1x4x4xf32> to vector<4x4xf32>
    %cst_14 = arith.constant dense<0.000000e+00> : vector<4x256xf32>
    %19 = tpu.matmul %18, %16, %cst_14 {dimension_numbers = #tpu.dot_dimension_numbers<[1], [0], [0], [1], [0, 0, 1, 1], [], []>} : vector<4x4xf32>, vector<4x256xf32>, vector<4x256xf32> -> vector<4x256xf32>
    %20 = arith.addf %15, %19 : vector<4x256xf32>
    %21 = vector.extract_strided_slice %3 {offsets = [0, 113], sizes = [4, 256], strides = [1, 1]} : vector<4x512xf32> to vector<4x256xf32>
    %c1_15 = arith.constant 1 : index
    %c0_16 = arith.constant 0 : index
    %c0_17 = arith.constant 0 : index
    %22 = vector.load %arg4[%c1_15, %c0_16, %c0_17] : memref<2x1x256xf32, #tpu.memory_space<vmem>>, vector<1x1x256xf32>
    %23 = vector.shape_cast %22 : vector<1x1x256xf32> to vector<1x256xf32>
    %24 = vector.broadcast %23 : vector<1x256xf32> to vector<4x256xf32>
    %25 = arith.mulf %21, %24 : vector<4x256xf32>
    %c2 = arith.constant 2 : index
    %c0_18 = arith.constant 0 : index
    %c0_19 = arith.constant 0 : index
    %26 = vector.load %arg2[%c2, %c0_18, %c0_19] : memref<9x4x4xf32, #tpu.memory_space<vmem>>, vector<1x4x4xf32>
    %27 = vector.shape_cast %26 : vector<1x4x4xf32> to vector<4x4xf32>
    %cst_20 = arith.constant dense<0.000000e+00> : vector<4x256xf32>
    %28 = tpu.matmul %27, %25, %cst_20 {dimension_numbers = #tpu.dot_dimension_numbers<[1], [0], [0], [1], [0, 0, 1, 1], [], []>} : vector<4x4xf32>, vector<4x256xf32>, vector<4x256xf32> -> vector<4x256xf32>
    %29 = arith.addf %20, %28 : vector<4x256xf32>
    %30 = vector.extract_strided_slice %3 {offsets = [0, 127], sizes = [4, 256], strides = [1, 1]} : vector<4x512xf32> to vector<4x256xf32>
    %c0_21 = arith.constant 0 : index
    %c0_22 = arith.constant 0 : index
    %c0_23 = arith.constant 0 : index
    %31 = vector.load %arg4[%c0_21, %c0_22, %c0_23] : memref<2x1x256xf32, #tpu.memory_space<vmem>>, vector<1x1x256xf32>
    %32 = vector.shape_cast %31 : vector<1x1x256xf32> to vector<1x256xf32>
    %33 = vector.broadcast %32 : vector<1x256xf32> to vector<4x256xf32>
    %34 = arith.mulf %30, %33 : vector<4x256xf32>
    %c3 = arith.constant 3 : index
    %c0_24 = arith.constant 0 : index
    %c0_25 = arith.constant 0 : index
    %35 = vector.load %arg2[%c3, %c0_24, %c0_25] : memref<9x4x4xf32, #tpu.memory_space<vmem>>, vector<1x4x4xf32>
    %36 = vector.shape_cast %35 : vector<1x4x4xf32> to vector<4x4xf32>
    %cst_26 = arith.constant dense<0.000000e+00> : vector<4x256xf32>
    %37 = tpu.matmul %36, %34, %cst_26 {dimension_numbers = #tpu.dot_dimension_numbers<[1], [0], [0], [1], [0, 0, 1, 1], [], []>} : vector<4x4xf32>, vector<4x256xf32>, vector<4x256xf32> -> vector<4x256xf32>
    %38 = arith.addf %29, %37 : vector<4x256xf32>
    %39 = vector.extract_strided_slice %3 {offsets = [0, 129], sizes = [4, 256], strides = [1, 1]} : vector<4x512xf32> to vector<4x256xf32>
    %c1_27 = arith.constant 1 : index
    %c0_28 = arith.constant 0 : index
    %c0_29 = arith.constant 0 : index
    %40 = vector.load %arg4[%c1_27, %c0_28, %c0_29] : memref<2x1x256xf32, #tpu.memory_space<vmem>>, vector<1x1x256xf32>
    %41 = vector.shape_cast %40 : vector<1x1x256xf32> to vector<1x256xf32>
    %42 = vector.broadcast %41 : vector<1x256xf32> to vector<4x256xf32>
    %43 = arith.mulf %39, %42 : vector<4x256xf32>
    %c5 = arith.constant 5 : index
    %c0_30 = arith.constant 0 : index
    %c0_31 = arith.constant 0 : index
    %44 = vector.load %arg2[%c5, %c0_30, %c0_31] : memref<9x4x4xf32, #tpu.memory_space<vmem>>, vector<1x4x4xf32>
    %45 = vector.shape_cast %44 : vector<1x4x4xf32> to vector<4x4xf32>
    %cst_32 = arith.constant dense<0.000000e+00> : vector<4x256xf32>
    %46 = tpu.matmul %45, %43, %cst_32 {dimension_numbers = #tpu.dot_dimension_numbers<[1], [0], [0], [1], [0, 0, 1, 1], [], []>} : vector<4x4xf32>, vector<4x256xf32>, vector<4x256xf32> -> vector<4x256xf32>
    %47 = arith.addf %38, %46 : vector<4x256xf32>
    %48 = vector.extract_strided_slice %3 {offsets = [0, 143], sizes = [4, 256], strides = [1, 1]} : vector<4x512xf32> to vector<4x256xf32>
    %c0_33 = arith.constant 0 : index
    %c0_34 = arith.constant 0 : index
    %c0_35 = arith.constant 0 : index
    %49 = vector.load %arg4[%c0_33, %c0_34, %c0_35] : memref<2x1x256xf32, #tpu.memory_space<vmem>>, vector<1x1x256xf32>
    %50 = vector.shape_cast %49 : vector<1x1x256xf32> to vector<1x256xf32>
    %51 = vector.broadcast %50 : vector<1x256xf32> to vector<4x256xf32>
    %52 = arith.mulf %48, %51 : vector<4x256xf32>
    %c6 = arith.constant 6 : index
    %c0_36 = arith.constant 0 : index
    %c0_37 = arith.constant 0 : index
    %53 = vector.load %arg2[%c6, %c0_36, %c0_37] : memref<9x4x4xf32, #tpu.memory_space<vmem>>, vector<1x4x4xf32>
    %54 = vector.shape_cast %53 : vector<1x4x4xf32> to vector<4x4xf32>
    %cst_38 = arith.constant dense<0.000000e+00> : vector<4x256xf32>
    %55 = tpu.matmul %54, %52, %cst_38 {dimension_numbers = #tpu.dot_dimension_numbers<[1], [0], [0], [1], [0, 0, 1, 1], [], []>} : vector<4x4xf32>, vector<4x256xf32>, vector<4x256xf32> -> vector<4x256xf32>
    %56 = arith.addf %47, %55 : vector<4x256xf32>
    %57 = vector.extract_strided_slice %3 {offsets = [0, 144], sizes = [4, 256], strides = [1, 1]} : vector<4x512xf32> to vector<4x256xf32>
    %c7 = arith.constant 7 : index
    %c0_39 = arith.constant 0 : index
    %c0_40 = arith.constant 0 : index
    %58 = vector.load %arg2[%c7, %c0_39, %c0_40] : memref<9x4x4xf32, #tpu.memory_space<vmem>>, vector<1x4x4xf32>
    %59 = vector.shape_cast %58 : vector<1x4x4xf32> to vector<4x4xf32>
    %cst_41 = arith.constant dense<0.000000e+00> : vector<4x256xf32>
    %60 = tpu.matmul %59, %57, %cst_41 {dimension_numbers = #tpu.dot_dimension_numbers<[1], [0], [0], [1], [0, 0, 1, 1], [], []>} : vector<4x4xf32>, vector<4x256xf32>, vector<4x256xf32> -> vector<4x256xf32>
    %61 = arith.addf %56, %60 : vector<4x256xf32>
    %62 = vector.extract_strided_slice %3 {offsets = [0, 145], sizes = [4, 256], strides = [1, 1]} : vector<4x512xf32> to vector<4x256xf32>
    %c1_42 = arith.constant 1 : index
    %c0_43 = arith.constant 0 : index
    %c0_44 = arith.constant 0 : index
    %63 = vector.load %arg4[%c1_42, %c0_43, %c0_44] : memref<2x1x256xf32, #tpu.memory_space<vmem>>, vector<1x1x256xf32>
    %64 = vector.shape_cast %63 : vector<1x1x256xf32> to vector<1x256xf32>
    %65 = vector.broadcast %64 : vector<1x256xf32> to vector<4x256xf32>
    %66 = arith.mulf %62, %65 : vector<4x256xf32>
    %c8 = arith.constant 8 : index
    %c0_45 = arith.constant 0 : index
    %c0_46 = arith.constant 0 : index
    %67 = vector.load %arg2[%c8, %c0_45, %c0_46] : memref<9x4x4xf32, #tpu.memory_space<vmem>>, vector<1x4x4xf32>
    %68 = vector.shape_cast %67 : vector<1x4x4xf32> to vector<4x4xf32>
    %cst_47 = arith.constant dense<0.000000e+00> : vector<4x256xf32>
    %69 = tpu.matmul %68, %66, %cst_47 {dimension_numbers = #tpu.dot_dimension_numbers<[1], [0], [0], [1], [0, 0, 1, 1], [], []>} : vector<4x4xf32>, vector<4x256xf32>, vector<4x256xf32> -> vector<4x256xf32>
    %70 = arith.addf %61, %69 : vector<4x256xf32>
    %cst_48 = arith.constant dense<0.000000e+00> : vector<4xf32>
    %71 = vector.multi_reduction <add>, %70, %cst_48 [1] : vector<4x256xf32> to vector<4xf32>
    %72 = vector.shape_cast %71 : vector<4xf32> to vector<4x1xf32>
    %cst_49 = arith.constant 3.906250e-03 : f32
    %73 = vector.broadcast %cst_49 : f32 to vector<4x1xf32>
    %74 = arith.mulf %72, %73 : vector<4x1xf32>
    %75 = arith.mulf %70, %70 : vector<4x256xf32>
    %cst_50 = arith.constant dense<0.000000e+00> : vector<4xf32>
    %76 = vector.multi_reduction <add>, %75, %cst_50 [1] : vector<4x256xf32> to vector<4xf32>
    %77 = vector.shape_cast %76 : vector<4xf32> to vector<4x1xf32>
    %cst_51 = arith.constant 3.906250e-03 : f32
    %78 = vector.broadcast %cst_51 : f32 to vector<4x1xf32>
    %79 = arith.mulf %77, %78 : vector<4x1xf32>
    %80 = arith.mulf %74, %74 : vector<4x1xf32>
    %81 = arith.subf %79, %80 : vector<4x1xf32>
    %82 = vector.broadcast %74 : vector<4x1xf32> to vector<4x256xf32>
    %83 = arith.subf %70, %82 : vector<4x256xf32>
    %cst_52 = arith.constant 9.99999974E-6 : f32
    %84 = vector.broadcast %cst_52 : f32 to vector<4x1xf32>
    %85 = arith.addf %81, %84 : vector<4x1xf32>
    %86 = math.rsqrt %85 : vector<4x1xf32>
    %87 = vector.broadcast %86 : vector<4x1xf32> to vector<4x256xf32>
    %88 = arith.mulf %83, %87 : vector<4x256xf32>
    %cst_53 = arith.constant 5.000000e-01 : f32
    %89 = vector.broadcast %cst_53 : f32 to vector<4x256xf32>
    %90 = arith.mulf %89, %88 : vector<4x256xf32>
    %cst_54 = arith.constant 0.707106769 : f32
    %91 = vector.broadcast %cst_54 : f32 to vector<4x256xf32>
    %92 = arith.mulf %88, %91 : vector<4x256xf32>
    %93 = math.erf %92 : vector<4x256xf32>
    %cst_55 = arith.constant 1.000000e+00 : f32
    %94 = vector.broadcast %cst_55 : f32 to vector<4x256xf32>
    %95 = arith.addf %94, %93 : vector<4x256xf32>
    %96 = arith.mulf %90, %95 : vector<4x256xf32>
    %97 = tpu.concatenate %2, %96, %2 in 1 : vector<4x128xf32>, vector<4x256xf32>, vector<4x128xf32> -> vector<4x512xf32>
    %c4_56 = arith.constant 4 : index
    %c0_57 = arith.constant 0 : index
    %c0_58 = arith.constant 0 : index
    %98 = vector.load %arg3[%c4_56, %c0_57, %c0_58] : memref<9x4x4xf32, #tpu.memory_space<vmem>>, vector<1x4x4xf32>
    %99 = vector.shape_cast %98 : vector<1x4x4xf32> to vector<4x4xf32>
    %cst_59 = arith.constant dense<0.000000e+00> : vector<4x256xf32>
    %100 = tpu.matmul %99, %96, %cst_59 {dimension_numbers = #tpu.dot_dimension_numbers<[1], [0], [0], [1], [0, 0, 1, 1], [], []>} : vector<4x4xf32>, vector<4x256xf32>, vector<4x256xf32> -> vector<4x256xf32>
    %101 = vector.extract_strided_slice %97 {offsets = [0, 111], sizes = [4, 256], strides = [1, 1]} : vector<4x512xf32> to vector<4x256xf32>
    %c0_60 = arith.constant 0 : index
    %c0_61 = arith.constant 0 : index
    %c0_62 = arith.constant 0 : index
    %102 = vector.load %arg4[%c0_60, %c0_61, %c0_62] : memref<2x1x256xf32, #tpu.memory_space<vmem>>, vector<1x1x256xf32>
    %103 = vector.shape_cast %102 : vector<1x1x256xf32> to vector<1x256xf32>
    %104 = vector.broadcast %103 : vector<1x256xf32> to vector<4x256xf32>
    %105 = arith.mulf %101, %104 : vector<4x256xf32>
    %c0_63 = arith.constant 0 : index
    %c0_64 = arith.constant 0 : index
    %c0_65 = arith.constant 0 : index
    %106 = vector.load %arg3[%c0_63, %c0_64, %c0_65] : memref<9x4x4xf32, #tpu.memory_space<vmem>>, vector<1x4x4xf32>
    %107 = vector.shape_cast %106 : vector<1x4x4xf32> to vector<4x4xf32>
    %cst_66 = arith.constant dense<0.000000e+00> : vector<4x256xf32>
    %108 = tpu.matmul %107, %105, %cst_66 {dimension_numbers = #tpu.dot_dimension_numbers<[1], [0], [0], [1], [0, 0, 1, 1], [], []>} : vector<4x4xf32>, vector<4x256xf32>, vector<4x256xf32> -> vector<4x256xf32>
    %109 = arith.addf %100, %108 : vector<4x256xf32>
    %110 = vector.extract_strided_slice %97 {offsets = [0, 112], sizes = [4, 256], strides = [1, 1]} : vector<4x512xf32> to vector<4x256xf32>
    %c1_67 = arith.constant 1 : index
    %c0_68 = arith.constant 0 : index
    %c0_69 = arith.constant 0 : index
    %111 = vector.load %arg3[%c1_67, %c0_68, %c0_69] : memref<9x4x4xf32, #tpu.memory_space<vmem>>, vector<1x4x4xf32>
    %112 = vector.shape_cast %111 : vector<1x4x4xf32> to vector<4x4xf32>
    %cst_70 = arith.constant dense<0.000000e+00> : vector<4x256xf32>
    %113 = tpu.matmul %112, %110, %cst_70 {dimension_numbers = #tpu.dot_dimension_numbers<[1], [0], [0], [1], [0, 0, 1, 1], [], []>} : vector<4x4xf32>, vector<4x256xf32>, vector<4x256xf32> -> vector<4x256xf32>
    %114 = arith.addf %109, %113 : vector<4x256xf32>
    %115 = vector.extract_strided_slice %97 {offsets = [0, 113], sizes = [4, 256], strides = [1, 1]} : vector<4x512xf32> to vector<4x256xf32>
    %c1_71 = arith.constant 1 : index
    %c0_72 = arith.constant 0 : index
    %c0_73 = arith.constant 0 : index
    %116 = vector.load %arg4[%c1_71, %c0_72, %c0_73] : memref<2x1x256xf32, #tpu.memory_space<vmem>>, vector<1x1x256xf32>
    %117 = vector.shape_cast %116 : vector<1x1x256xf32> to vector<1x256xf32>
    %118 = vector.broadcast %117 : vector<1x256xf32> to vector<4x256xf32>
    %119 = arith.mulf %115, %118 : vector<4x256xf32>
    %c2_74 = arith.constant 2 : index
    %c0_75 = arith.constant 0 : index
    %c0_76 = arith.constant 0 : index
    %120 = vector.load %arg3[%c2_74, %c0_75, %c0_76] : memref<9x4x4xf32, #tpu.memory_space<vmem>>, vector<1x4x4xf32>
    %121 = vector.shape_cast %120 : vector<1x4x4xf32> to vector<4x4xf32>
    %cst_77 = arith.constant dense<0.000000e+00> : vector<4x256xf32>
    %122 = tpu.matmul %121, %119, %cst_77 {dimension_numbers = #tpu.dot_dimension_numbers<[1], [0], [0], [1], [0, 0, 1, 1], [], []>} : vector<4x4xf32>, vector<4x256xf32>, vector<4x256xf32> -> vector<4x256xf32>
    %123 = arith.addf %114, %122 : vector<4x256xf32>
    %124 = vector.extract_strided_slice %97 {offsets = [0, 127], sizes = [4, 256], strides = [1, 1]} : vector<4x512xf32> to vector<4x256xf32>
    %c0_78 = arith.constant 0 : index
    %c0_79 = arith.constant 0 : index
    %c0_80 = arith.constant 0 : index
    %125 = vector.load %arg4[%c0_78, %c0_79, %c0_80] : memref<2x1x256xf32, #tpu.memory_space<vmem>>, vector<1x1x256xf32>
    %126 = vector.shape_cast %125 : vector<1x1x256xf32> to vector<1x256xf32>
    %127 = vector.broadcast %126 : vector<1x256xf32> to vector<4x256xf32>
    %128 = arith.mulf %124, %127 : vector<4x256xf32>
    %c3_81 = arith.constant 3 : index
    %c0_82 = arith.constant 0 : index
    %c0_83 = arith.constant 0 : index
    %129 = vector.load %arg3[%c3_81, %c0_82, %c0_83] : memref<9x4x4xf32, #tpu.memory_space<vmem>>, vector<1x4x4xf32>
    %130 = vector.shape_cast %129 : vector<1x4x4xf32> to vector<4x4xf32>
    %cst_84 = arith.constant dense<0.000000e+00> : vector<4x256xf32>
    %131 = tpu.matmul %130, %128, %cst_84 {dimension_numbers = #tpu.dot_dimension_numbers<[1], [0], [0], [1], [0, 0, 1, 1], [], []>} : vector<4x4xf32>, vector<4x256xf32>, vector<4x256xf32> -> vector<4x256xf32>
    %132 = arith.addf %123, %131 : vector<4x256xf32>
    %133 = vector.extract_strided_slice %97 {offsets = [0, 129], sizes = [4, 256], strides = [1, 1]} : vector<4x512xf32> to vector<4x256xf32>
    %c1_85 = arith.constant 1 : index
    %c0_86 = arith.constant 0 : index
    %c0_87 = arith.constant 0 : index
    %134 = vector.load %arg4[%c1_85, %c0_86, %c0_87] : memref<2x1x256xf32, #tpu.memory_space<vmem>>, vector<1x1x256xf32>
    %135 = vector.shape_cast %134 : vector<1x1x256xf32> to vector<1x256xf32>
    %136 = vector.broadcast %135 : vector<1x256xf32> to vector<4x256xf32>
    %137 = arith.mulf %133, %136 : vector<4x256xf32>
    %c5_88 = arith.constant 5 : index
    %c0_89 = arith.constant 0 : index
    %c0_90 = arith.constant 0 : index
    %138 = vector.load %arg3[%c5_88, %c0_89, %c0_90] : memref<9x4x4xf32, #tpu.memory_space<vmem>>, vector<1x4x4xf32>
    %139 = vector.shape_cast %138 : vector<1x4x4xf32> to vector<4x4xf32>
    %cst_91 = arith.constant dense<0.000000e+00> : vector<4x256xf32>
    %140 = tpu.matmul %139, %137, %cst_91 {dimension_numbers = #tpu.dot_dimension_numbers<[1], [0], [0], [1], [0, 0, 1, 1], [], []>} : vector<4x4xf32>, vector<4x256xf32>, vector<4x256xf32> -> vector<4x256xf32>
    %141 = arith.addf %132, %140 : vector<4x256xf32>
    %142 = vector.extract_strided_slice %97 {offsets = [0, 143], sizes = [4, 256], strides = [1, 1]} : vector<4x512xf32> to vector<4x256xf32>
    %c0_92 = arith.constant 0 : index
    %c0_93 = arith.constant 0 : index
    %c0_94 = arith.constant 0 : index
    %143 = vector.load %arg4[%c0_92, %c0_93, %c0_94] : memref<2x1x256xf32, #tpu.memory_space<vmem>>, vector<1x1x256xf32>
    %144 = vector.shape_cast %143 : vector<1x1x256xf32> to vector<1x256xf32>
    %145 = vector.broadcast %144 : vector<1x256xf32> to vector<4x256xf32>
    %146 = arith.mulf %142, %145 : vector<4x256xf32>
    %c6_95 = arith.constant 6 : index
    %c0_96 = arith.constant 0 : index
    %c0_97 = arith.constant 0 : index
    %147 = vector.load %arg3[%c6_95, %c0_96, %c0_97] : memref<9x4x4xf32, #tpu.memory_space<vmem>>, vector<1x4x4xf32>
    %148 = vector.shape_cast %147 : vector<1x4x4xf32> to vector<4x4xf32>
    %cst_98 = arith.constant dense<0.000000e+00> : vector<4x256xf32>
    %149 = tpu.matmul %148, %146, %cst_98 {dimension_numbers = #tpu.dot_dimension_numbers<[1], [0], [0], [1], [0, 0, 1, 1], [], []>} : vector<4x4xf32>, vector<4x256xf32>, vector<4x256xf32> -> vector<4x256xf32>
    %150 = arith.addf %141, %149 : vector<4x256xf32>
    %151 = vector.extract_strided_slice %97 {offsets = [0, 144], sizes = [4, 256], strides = [1, 1]} : vector<4x512xf32> to vector<4x256xf32>
    %c7_99 = arith.constant 7 : index
    %c0_100 = arith.constant 0 : index
    %c0_101 = arith.constant 0 : index
    %152 = vector.load %arg3[%c7_99, %c0_100, %c0_101] : memref<9x4x4xf32, #tpu.memory_space<vmem>>, vector<1x4x4xf32>
    %153 = vector.shape_cast %152 : vector<1x4x4xf32> to vector<4x4xf32>
    %cst_102 = arith.constant dense<0.000000e+00> : vector<4x256xf32>
    %154 = tpu.matmul %153, %151, %cst_102 {dimension_numbers = #tpu.dot_dimension_numbers<[1], [0], [0], [1], [0, 0, 1, 1], [], []>} : vector<4x4xf32>, vector<4x256xf32>, vector<4x256xf32> -> vector<4x256xf32>
    %155 = arith.addf %150, %154 : vector<4x256xf32>
    %156 = vector.extract_strided_slice %97 {offsets = [0, 145], sizes = [4, 256], strides = [1, 1]} : vector<4x512xf32> to vector<4x256xf32>
    %c1_103 = arith.constant 1 : index
    %c0_104 = arith.constant 0 : index
    %c0_105 = arith.constant 0 : index
    %157 = vector.load %arg4[%c1_103, %c0_104, %c0_105] : memref<2x1x256xf32, #tpu.memory_space<vmem>>, vector<1x1x256xf32>
    %158 = vector.shape_cast %157 : vector<1x1x256xf32> to vector<1x256xf32>
    %159 = vector.broadcast %158 : vector<1x256xf32> to vector<4x256xf32>
    %160 = arith.mulf %156, %159 : vector<4x256xf32>
    %c8_106 = arith.constant 8 : index
    %c0_107 = arith.constant 0 : index
    %c0_108 = arith.constant 0 : index
    %161 = vector.load %arg3[%c8_106, %c0_107, %c0_108] : memref<9x4x4xf32, #tpu.memory_space<vmem>>, vector<1x4x4xf32>
    %162 = vector.shape_cast %161 : vector<1x4x4xf32> to vector<4x4xf32>
    %cst_109 = arith.constant dense<0.000000e+00> : vector<4x256xf32>
    %163 = tpu.matmul %162, %160, %cst_109 {dimension_numbers = #tpu.dot_dimension_numbers<[1], [0], [0], [1], [0, 0, 1, 1], [], []>} : vector<4x4xf32>, vector<4x256xf32>, vector<4x256xf32> -> vector<4x256xf32>
    %164 = arith.addf %155, %163 : vector<4x256xf32>
    %cst_110 = arith.constant dense<0.000000e+00> : vector<4xf32>
    %165 = vector.multi_reduction <add>, %164, %cst_110 [1] : vector<4x256xf32> to vector<4xf32>
    %166 = vector.shape_cast %165 : vector<4xf32> to vector<4x1xf32>
    %cst_111 = arith.constant 3.906250e-03 : f32
    %167 = vector.broadcast %cst_111 : f32 to vector<4x1xf32>
    %168 = arith.mulf %166, %167 : vector<4x1xf32>
    %169 = arith.mulf %164, %164 : vector<4x256xf32>
    %cst_112 = arith.constant dense<0.000000e+00> : vector<4xf32>
    %170 = vector.multi_reduction <add>, %169, %cst_112 [1] : vector<4x256xf32> to vector<4xf32>
    %171 = vector.shape_cast %170 : vector<4xf32> to vector<4x1xf32>
    %cst_113 = arith.constant 3.906250e-03 : f32
    %172 = vector.broadcast %cst_113 : f32 to vector<4x1xf32>
    %173 = arith.mulf %171, %172 : vector<4x1xf32>
    %174 = arith.mulf %168, %168 : vector<4x1xf32>
    %175 = arith.subf %173, %174 : vector<4x1xf32>
    %176 = vector.broadcast %168 : vector<4x1xf32> to vector<4x256xf32>
    %177 = arith.subf %164, %176 : vector<4x256xf32>
    %cst_114 = arith.constant 9.99999974E-6 : f32
    %178 = vector.broadcast %cst_114 : f32 to vector<4x1xf32>
    %179 = arith.addf %175, %178 : vector<4x1xf32>
    %180 = math.rsqrt %179 : vector<4x1xf32>
    %181 = vector.broadcast %180 : vector<4x1xf32> to vector<4x256xf32>
    %182 = arith.mulf %177, %181 : vector<4x256xf32>
    %cst_115 = arith.constant 5.000000e-01 : f32
    %183 = vector.broadcast %cst_115 : f32 to vector<4x256xf32>
    %184 = arith.mulf %183, %182 : vector<4x256xf32>
    %cst_116 = arith.constant 0.707106769 : f32
    %185 = vector.broadcast %cst_116 : f32 to vector<4x256xf32>
    %186 = arith.mulf %182, %185 : vector<4x256xf32>
    %187 = math.erf %186 : vector<4x256xf32>
    %cst_117 = arith.constant 1.000000e+00 : f32
    %188 = vector.broadcast %cst_117 : f32 to vector<4x256xf32>
    %189 = arith.addf %188, %187 : vector<4x256xf32>
    %190 = arith.mulf %184, %189 : vector<4x256xf32>
    %191 = arith.addf %190, %1 : vector<4x256xf32>
    %c0_118 = arith.constant 0 : index
    %c0_119 = arith.constant 0 : index
    %c0_120 = arith.constant 0 : index
    %192 = vector.load %arg5[%c0_118, %c0_119, %c0_120] : memref<1x4x256xf32, #tpu.memory_space<vmem>>, vector<1x4x256xf32>
    %193 = vector.shape_cast %192 : vector<1x4x256xf32> to vector<4x256xf32>
    %194 = vector.shape_cast %191 : vector<4x256xf32> to vector<1x4x256xf32>
    tpu.vector_store %arg5[%c0_118, %c0_119, %c0_120], %194 {strides = array<i32>} : memref<1x4x256xf32, #tpu.memory_space<vmem>>, vector<1x4x256xf32>,
    return
  }
  func.func @transform_0(%arg0: i32) -> (i32, i32, i32) {
    %c0_i32 = arith.constant 0 : i32
    %c0_i32_0 = arith.constant 0 : i32
    %c0_i32_1 = arith.constant 0 : i32
    return %arg0, %c0_i32, %c0_i32_0 : i32, i32, i32
  }
  func.func @transform_1(%arg0: i32) -> (i32, i32, i32) {
    %c0_i32 = arith.constant 0 : i32
    %c0_i32_0 = arith.constant 0 : i32
    %c0_i32_1 = arith.constant 0 : i32
    %c0_i32_2 = arith.constant 0 : i32
    return %c0_i32, %c0_i32_0, %c0_i32_1 : i32, i32, i32
  }
  func.func @transform_2(%arg0: i32) -> (i32, i32, i32) {
    %c0_i32 = arith.constant 0 : i32
    %c0_i32_0 = arith.constant 0 : i32
    %c0_i32_1 = arith.constant 0 : i32
    %c0_i32_2 = arith.constant 0 : i32
    return %c0_i32, %c0_i32_0, %c0_i32_1 : i32, i32, i32
  }
  func.func @transform_3(%arg0: i32) -> (i32, i32, i32) {
    %c0_i32 = arith.constant 0 : i32
    %c0_i32_0 = arith.constant 0 : i32
    %c0_i32_1 = arith.constant 0 : i32
    %c0_i32_2 = arith.constant 0 : i32
    return %c0_i32, %c0_i32_0, %c0_i32_1 : i32, i32, i32
  }
  func.func @transform_4(%arg0: i32) -> (i32, i32, i32) {
    %c0_i32 = arith.constant 0 : i32
    %c0_i32_0 = arith.constant 0 : i32
    %c0_i32_1 = arith.constant 0 : i32
    return %arg0, %c0_i32, %c0_i32_0 : i32, i32, i32
  }
}

</mosaic_0001>

<bundles_post_ra>
// kernel: tpu_custom_call.1
= control target key start
LH: loop header
LB: loop body
LE: loop exit
PB: predicated region body
PF: predicated region fallthrough
CT: control target
= control target key end

     0   :  { %9 = vsyncpa [#allocation3], 0  ;;  %s2411_s0 = inlined_call_operand.vmem [shape: f32[2,4,256], index: 0, kind: input, shape index: {}]   ;;  %s2412_s1 = inlined_call_operand.vmem [shape: f32[9,4,4], index: 1, kind: input, shape index: {}]   ;;  %s2413_s2 = inlined_call_operand.vmem [shape: f32[9,4,4], index: 2, kind: input, shape index: {}]   ;;  %s2414_s3 = inlined_call_operand.vmem [shape: f32[2,1,256], index: 3, kind: input, shape index: {}]   ;;  %s2415_s4 = inlined_call_operand.hbm [shape: f32[2,4,256], index: 4, kind: output, shape index: {}]  }
   0x1   :  { %11 = vsyncpa [#allocation3 + $0x1], 0  ;;  %s1948_s15 = smov 0   ;;  %s1950_s16 = smov 0  }
   0x2   :  { %s1952_s17 = smov 0   ;;  %s1954_s18 = smov 0  }
   0x3 LB: > { %s1969_s19 = sadd.s32 4294967295, %s1912_s18   ;;  %s1683_s20 = sadd.s32 4294967294, %s1912_s18   ;;  %s1912_s18 = sphi %s1954_s18, %s2427_s18   ;;  %s1908_s17 = sphi %s1952_s17, %s2426_s17   ;;  %s1904_s16 = sphi %s1950_s16, %s2425_s16   ;;  %s1900_s15 = sphi %s1948_s15, %s2424_s15  }
   0x4   : > { %s1973_s21 = sadd.s32 1, %s1912_s18   ;;  %s113_s22 = sadd.s32 1, %s1908_s17 }
   0x5   : > { %s110_s23 = ssub.s32 %s1912_s18, %s1973_s21  ;;  %p123_p0 = scmp.ne.s32.totalorder %s1908_s17, %s1904_s16 }
   0x6   : > { %p111_p1 = scmp.eq.s32.totalorder %s110_s23, 0  ;;  %p124_p2 = scmp.eq.s32.totalorder %s1969_s19, 1 }
   0x7   : > { %p129_p3 = scmp.ne.s32.totalorder %s1904_s16, %s1900_s15  ;;  %p130_p4 = scmp.eq.s32.totalorder %s1683_s20, 1 }
   0x8   : > { %s1984_s24 = scalar_select %p111_p1, %s1908_s17, %s113_s22  }
   0x9   : > { %p1986_p5 = por %p124_p2, %p123_p0  ;;  %p1990_p6 = por %p130_p4, %p129_p3 }
   0xa   : > { %p1686_p7 = scmp.ge.s32.totalorder %s1912_s18, 1  ;;  %p165_p8 = scmp.lt.s32.totalorder %s1912_s18, 3 }
   0xc   : > { %p166_p9 = pnand %p1686_p7, %p165_p8 }
   0xd   : > { %s1914_s5 = smov (!%p166_p9), 113   ;;  %s1915_s6 = smov (!%p166_p9), 111  }
   0xe   : > { %169 = sbr.rel (%p166_p9) target bundleno = 1134 (0x46e), region = 36  ;;  %p191_p10 = scmp.lt.s32.totalorder (!%p166_p9), %s1969_s19, 1 }
   0xf   : > { %s1916_s7 = smov (!%p166_p9), 127   ;;  %s1917_s13 = smov (!%p166_p9), 1  }
  0x10   : > { %s1918_s14 = smov (!%p166_p9), 15   ;;  %s1919_s20 = smov (!%p166_p9), 17  }
  0x11   : > { %s1921_s22 = smov (!%p166_p9), 16   ;;  %s1922_s23 = smov (!%p166_p9), 112  }
  0x12   : > { %s1870_s10 = scalar_lea.hbm (!%p166_p9), %s2415_s4, 16 }
  0x13   : > { %v1704_v0 = vld [vmem:[%s2414_s3 + $0x2] sm:$0x3]  ;;  %v205_v1 = vld [vmem:[%s2414_s3] sm:$0x3]  ;;  %s192_s8 = scalar_select %p191_p10, %s1969_s19, 1  ;;  %v1920_v9 = vmov 0.0  }
  0x14   : > { %v397_v2 = vperm.slane %v1704_v0, 0  ;;  %v207_v3 = vperm.slane %v205_v1, 0  ;;  %v398_v4 = vperm.slane %v1704_v0, 1  ;;  %v208_v5 = vperm.slane %v205_v1, 1  ;;  %v1690_v50 = vld [vmem:[%s2412_s1 + $0x10] sm:$0xf] }
  0x15   : > { %s1788_s9 = sshll.u32 %s192_s8, 3  ;;  %vm213_vm0 = vcmask 908288   ;;  %vm403_vm1 = vcmask 924672   ;;  %vm2417_vm2 = vcmask 1039360   ;;  %vm497_vm3 = vcmask 7168  }
  0x16   : > { %399 = vrot.lane.b32.xlu1 %v397_v2, %s1914_s5  ;;  %209 = vrot.lane.b32.xlu0 %v207_v3, %s1915_s6  ;;  %s195_s12 = scalar_lea.vmem %s2411_s0, %s1788_s9  ;;  %vm422_vm4 = vcmask 121856   ;;  %vm231_vm5 = vcmask 138240   ;;  %vm238_vm6 = vcmask 1043456   ;;  %vm234_vm7 = vcmask 31744   ;;  %v221_v60 = vld [vmem:[%s2412_s1] sm:$0xf] }
  0x17   : > { %474 = vrot.lane.b32.xlu2 %v207_v3, %s1916_s7  ;;  %v2010_v6 = vld [vmem:[%s195_s12] sm:$0xff]  ;;  %vm342_vm8 = vcmask 130048   ;;  %vm2416_vm9 = vcmask 916480  }
  0x18   : > { %198 = vst [vmem:[#allocation1] ss:$2 sm:$0xff] %v2010_v6 }
  0x1e   : > { %401 = vrot.lane.b32.xlu1 %v398_v4, %s1914_s5  ;;  %211 = vrot.lane.b32.xlu0 %v208_v5, %s1915_s6 }
  0x1f   : > { %476 = vrot.lane.b32.xlu2 %v208_v5, %s1916_s7  ;;  %v2016_v7 = vld.sshfl [vmem:[#allocation1 + $0x8] sm:$0xff pattern:$0x75316420]  ;;  %v2018_v8 = vld.sshfl [vmem:[#allocation1] sm:$0xff pattern:$0x75316420] }
  0x20   : > { %283 = vst [vmem:[#allocation1] ss:$2 sm:$0xff] %v2010_v6 }
  0x26   : > { %551 = vrot.lane.b32.xlu1 %v398_v4, %s1917_s13  ;;  %549 = vrot.lane.b32.xlu0 %v397_v2, %s1917_s13 }
  0x27   : > { %622 = vrot.lane.b32.xlu2 %v207_v3, %s1918_s14  ;;  %v284_v47 = vld.sshfl [vmem:[#allocation1] sm:$0xff pattern:$0x75316420]  ;;  %v285_v48 = vld.sshfl [vmem:[#allocation1 + $0x8] sm:$0xff pattern:$0x75316420] }
  0x28   : > { %1695 = vmatpush.msk.msra.mxu2 %vm238_vm6, %v284_v47  ;;  %1697 = vmatpush.msk.msra.mxu3 %vm238_vm6, %v285_v48  ;;  %1594 = vst [vmem:[#allocation1] ss:$2 sm:$0xff] %v2010_v6 }
  0x29   : > { %1696 = vmatmul.msk.f32.vlgmr.msra.gmra.mxu2 %vm234_vm7, %v1690_v50  ;;  %1698 = vmatmul.msk.f32.vlgmr.msra.gmra.mxu3 %vm234_vm7, %v1690_v50 }
  0x2e   : > { %624 = vrot.lane.b32.xlu0 %v208_v5, %s1918_s14  ;;  %755 = vrot.lane.b32.xlu1 %v397_v2, %s1919_s20  ;;  %v1699_v2 = vld [vmem:[%s2412_s1 + $0x4] sm:$0xf]  ;;  %v1705_v5 = vld [vmem:[%s2412_s1 + $0x8] sm:$0xf] }
  0x2f   : > { %757 = vrot.lane.b32.xlu2 %v398_v4, %s1919_s20 }
  0x36   : > { %336 = vrot.lane.b32.xlu0 %v1920_v9, %s1921_s22  ;;  %338 = vrot.lane.b32.xlu1 %v2018_v8, %s1921_s22 }
  0x37   : > { %340 = vrot.lane.b32.xlu2 %v2016_v7, %s1921_s22 }
  0x3e   : > { %697 = vrot.lane.b32.xlu0 %v2018_v8, %s1922_s23  ;;  %699 = vrot.lane.b32.xlu1 %v2016_v7, %s1922_s23 }
  0x3f   : > { %701 = vrot.lane.b32.xlu2 %v1920_v9, %s1922_s23  ;;  %v1710_v9 = vld [vmem:[%s2412_s1 + $0xc] sm:$0xf] }
  0x71   : > { %v475_v17 = vpop.permute.xlu2 %474 }
  0x72   : > { %v483_v22 = vmul.f32 0.0, %v475_v17 }
  0x79   : > { %v2063_v24 = vpop.permute.xlu2 %476 }
  0x7a   : > { %v2070_v26 = vsel %vm2417_vm2, %v475_v17, %v2063_v24  ;;  %v485_v27 = vmul.f32 %v2063_v24, %v2016_v7  ;;  %v1715_v17 = vld [vmem:[%s2412_s1 + $0x14] sm:$0xf] }
  0x7b   : > { %v484_v29 = vmul.f32 %v2070_v26, %v2018_v8 }
  0x81   : > { %v2081_v31 = vpop.permute.xlu2 %622 }
  0x82   : > { %v630_v34 = vmul.f32 %v2081_v31, %v2018_v8 }
  0x88   : > { %v210_v10 = vpop.permute.xlu0 %209  ;;  %v400_v12 = vpop.permute.xlu1 %399 }
  0x89   : > { %v218_v11 = vmul.f32 0.0, %v210_v10  ;;  %v408_v13 = vmul.f32 0.0, %v400_v12  ;;  %v758_v42 = vpop.permute.xlu2 %757 }
  0x8a   : > { %v765_v44 = vmul.f32 0.0, %v758_v42 }
  0x8b   : > { %225 = vrot.lane.b32.xlu0 %v218_v11, %s1919_s20 }
  0x90   : > { %v2038_v14 = vpop.permute.xlu0 %211  ;;  %v2050_v19 = vpop.permute.xlu1 %401 }
  0x91   : > { %v2042_v15 = vsel %vm213_vm0, %v210_v10, %v2038_v14  ;;  %v220_v16 = vmul.f32 %v2038_v14, %v2016_v7  ;;  %v2055_v20 = vsel %vm403_vm1, %v400_v12, %v2050_v19  ;;  %v410_v21 = vmul.f32 %v2050_v19, %v2016_v7  ;;  %v341_v46 = vpop.permute.xlu2 %340 }
  0x92   : > { %v219_v18 = vmul.f32 %v2042_v15, %v2018_v8  ;;  %v409_v23 = vmul.f32 %v2055_v20, %v2018_v8 }
  0x93   : > { %229 = vrot.lane.b32.xlu2 %v220_v16, %s1919_s20  ;;  %416 = vrot.lane.b32.xlu0 %v408_v13, %s1918_s14 }
  0x94   : > { %227 = vrot.lane.b32.xlu1 %v219_v18, %s1919_s20 }
  0x98   : > { %v2066_v25 = vpop.permute.xlu0 %549  ;;  %v552_v30 = vpop.permute.xlu1 %551 }
  0x99   : > { %v557_v28 = vmul.f32 %v2066_v25, %v2018_v8  ;;  %v2085_v32 = vsel %vm497_vm3, %v2066_v25, %v552_v30  ;;  %v559_v33 = vmul.f32 0.0, %v552_v30  ;;  %v2125_v51 = vpop.permute.xlu2 %701  ;;  %v1720_v30 = vld [vmem:[%s2412_s1 + $0x18] sm:$0xf] }
  0x9a   : > { %v558_v35 = vmul.f32 %v2085_v32, %v2016_v7 }
  0x9b   : > { %420 = vrot.lane.b32.xlu2 %v410_v21, %s1918_s14  ;;  %491 = vrot.lane.b32.xlu0 %v483_v22, %s1917_s13 }
  0x9c   : > { %418 = vrot.lane.b32.xlu1 %v409_v23, %s1918_s14 }
  0xa0   : > { %v625_v36 = vpop.permute.xlu0 %624  ;;  %v2094_v37 = vpop.permute.xlu1 %755 }
  0xa1   : > { %v2098_v38 = vsel %vm422_vm4, %v2081_v31, %v625_v36  ;;  %v632_v39 = vmul.f32 0.0, %v625_v36  ;;  %v763_v40 = vmul.f32 %v2094_v37, %v2018_v8  ;;  %v2109_v43 = vsel %vm231_vm5, %v2094_v37, %v758_v42 }
  0xa2   : > { %v631_v41 = vmul.f32 %v2098_v38, %v2016_v7  ;;  %v764_v45 = vmul.f32 %v2109_v43, %v2016_v7 }
  0xa3   : > { %495 = vrot.lane.b32.xlu2 %v485_v27, %s1917_s13  ;;  %565 = vrot.lane.b32.xlu0 %v557_v28, %s1916_s7 }
  0xa4   : > { %493 = vrot.lane.b32.xlu1 %v484_v29, %s1917_s13 }
  0xa8   : > { %v2116_v49 = vpop.permute.xlu0 %336  ;;  %v339_v52 = vpop.permute.xlu1 %338 }
  0xa9   : > { %v343_v63 = vsel %vm342_vm8, %v2116_v49, %v339_v52  ;;  %v344_v0 = vsel %vm342_vm8, %v339_v52, %v341_v46 }
  0xab   : > { %569 = vrot.lane.b32.xlu2 %v559_v33, %s1916_s7  ;;  %638 = vrot.lane.b32.xlu0 %v630_v34, %s1914_s5 }
  0xac   : > { %567 = vrot.lane.b32.xlu1 %v558_v35, %s1916_s7  ;;  %v1725_v35 = vld [vmem:[%s2412_s1 + $0x1c] sm:$0xf]  ;;  %v310_v47 = vpop.f32.mrf.mxu2  ;;  %v330_v48 = vpop.f32.mrf.mxu3 }
  0xb0   : > { %v698_v53 = vpop.permute.xlu0 %697  ;;  %v700_v55 = vpop.permute.xlu1 %699 }
  0xb1   : > { %v704_v22 = vsel %vm2416_vm9, %v698_v53, %v700_v55  ;;  %v705_v23 = vsel %vm2416_vm9, %v700_v55, %v2125_v51 }
  0xb3   : > { %642 = vrot.lane.b32.xlu2 %v632_v39, %s1914_s5  ;;  %771 = vrot.lane.b32.xlu0 %v763_v40, %s1915_s6 }
  0xb4   : > { %640 = vrot.lane.b32.xlu1 %v631_v41, %s1914_s5  ;;  %v1730_v41 = vld [vmem:[%s2412_s1 + $0x20] sm:$0xf] }
  0xbb   : > { %775 = vrot.lane.b32.xlu2 %v765_v44, %s1915_s6 }
  0xbc   : > { %773 = vrot.lane.b32.xlu1 %v764_v45, %s1915_s6 }
  0xed   : > { %v230_v54 = vpop.permute.xlu2 %229 }
  0xf5   : > { %v421_v57 = vpop.permute.xlu2 %420 }
  0xfd   : > { %v2127_v56 = vpop.permute.xlu0 %225  ;;  %v496_v6 = vpop.permute.xlu2 %495 }
 0x105   : > { %v2129_v58 = vpop.permute.xlu0 %416  ;;  %v2173_v13 = vpop.permute.xlu2 %569 }
 0x106   : > { %v228_v59 = vpop.permute.xlu1 %227 }
 0x107   : > { %v232_v61 = vsel %vm231_vm5, %v2127_v56, %v228_v59  ;;  %v233_v62 = vsel %vm231_vm5, %v228_v59, %v230_v54 }
 0x108   : > { %1691 = vmatpush.msk.msra.mxu0 %vm238_vm6, %v232_v61  ;;  %1693 = vmatpush.msk.msra.mxu1 %vm238_vm6, %v233_v62 }
 0x109   : > { %1692 = vmatmul.msk.f32.vlgmr.msra.gmra.mxu0 %vm234_vm7, %v221_v60  ;;  %1694 = vmatmul.msk.f32.vlgmr.msra.gmra.mxu1 %vm234_vm7, %v221_v60 }
 0x10a   : > { %1700 = vmatpush.msk.msrb.mxu0 %vm238_vm6, %v343_v63  ;;  %1702 = vmatpush.msk.msrb.mxu1 %vm238_vm6, %v344_v0 }
 0x10d   : > { %v2155_v7 = vpop.permute.xlu0 %491  ;;  %v2190_v28 = vpop.permute.xlu2 %642 }
 0x10e   : > { %v419_v1 = vpop.permute.xlu1 %418 }
 0x10f   : > { %v423_v3 = vsel %vm422_vm4, %v2129_v58, %v419_v1  ;;  %v424_v4 = vsel %vm422_vm4, %v419_v1, %v421_v57 }
 0x110   : > { %1706 = vmatpush.msk.msrb.mxu2 %vm238_vm6, %v423_v3  ;;  %1708 = vmatpush.msk.msrb.mxu3 %vm238_vm6, %v424_v4 }
 0x111   : > { %1701 = vmatmul.msk.f32.vlgmr.msrb.gmra.mxu0 %vm234_vm7, %v1699_v2  ;;  %1703 = vmatmul.msk.f32.vlgmr.msrb.gmra.mxu1 %vm234_vm7, %v1699_v2 }
 0x112   : > { %1707 = vmatmul.msk.f32.vlgmr.msrb.gmra.mxu2 %vm234_vm7, %v1705_v5  ;;  %1709 = vmatmul.msk.f32.vlgmr.msrb.gmra.mxu3 %vm234_vm7, %v1705_v5 }
 0x115   : > { %v566_v12 = vpop.permute.xlu0 %565  ;;  %v2207_v39 = vpop.permute.xlu2 %775 }
 0x116   : > { %v494_v8 = vpop.permute.xlu1 %493 }
 0x117   : > { %v498_v10 = vsel %vm497_vm3, %v2155_v7, %v494_v8  ;;  %v499_v11 = vsel %vm497_vm3, %v494_v8, %v496_v6 }
 0x118   : > { %1711 = vmatpush.msk.msra.mxu0 %vm238_vm6, %v498_v10  ;;  %1713 = vmatpush.msk.msra.mxu1 %vm238_vm6, %v499_v11 }
 0x119   : > { %1712 = vmatmul.msk.f32.vlgmr.msra.gmra.mxu0 %vm234_vm7, %v1710_v9  ;;  %1714 = vmatmul.msk.f32.vlgmr.msra.gmra.mxu1 %vm234_vm7, %v1710_v9 }
 0x11d   : > { %v639_v27 = vpop.permute.xlu0 %638 }
 0x11e   : > { %v568_v16 = vpop.permute.xlu1 %567 }
 0x11f   : > { %v571_v18 = vsel %vm2417_vm2, %v566_v12, %v568_v16  ;;  %v572_v21 = vsel %vm2417_vm2, %v568_v16, %v2173_v13 }
 0x120   : > { %1716 = vmatpush.msk.msra.mxu2 %vm238_vm6, %v571_v18  ;;  %1718 = vmatpush.msk.msra.mxu3 %vm238_vm6, %v572_v21 }
 0x121   : > { %1717 = vmatmul.msk.f32.vlgmr.msra.gmra.mxu2 %vm234_vm7, %v1715_v17  ;;  %1719 = vmatmul.msk.f32.vlgmr.msra.gmra.mxu3 %vm234_vm7, %v1715_v17 }
 0x122   : > { %1726 = vmatpush.msk.msrb.mxu2 %vm238_vm6, %v704_v22  ;;  %1728 = vmatpush.msk.msrb.mxu3 %vm238_vm6, %v705_v23 }
 0x125   : > { %v772_v36 = vpop.permute.xlu0 %771 }
 0x126   : > { %v641_v29 = vpop.permute.xlu1 %640 }
 0x127   : > { %v644_v33 = vsel %vm403_vm1, %v639_v27, %v641_v29  ;;  %v645_v34 = vsel %vm403_vm1, %v641_v29, %v2190_v28 }
 0x128   : > { %1721 = vmatpush.msk.msrb.mxu0 %vm238_vm6, %v644_v33  ;;  %1723 = vmatpush.msk.msrb.mxu1 %vm238_vm6, %v645_v34 }
 0x129   : > { %1722 = vmatmul.msk.f32.vlgmr.msrb.gmra.mxu0 %vm234_vm7, %v1720_v30  ;;  %1724 = vmatmul.msk.f32.vlgmr.msrb.gmra.mxu1 %vm234_vm7, %v1720_v30 }
 0x12a   : > { %1727 = vmatmul.msk.f32.vlgmr.msrb.gmra.mxu2 %vm234_vm7, %v1725_v35  ;;  %1729 = vmatmul.msk.f32.vlgmr.msrb.gmra.mxu3 %vm234_vm7, %v1725_v35 }
 0x12e   : > { %v774_v40 = vpop.permute.xlu1 %773 }
 0x12f   : > { %v777_v42 = vsel %vm213_vm0, %v772_v36, %v774_v40  ;;  %v778_v44 = vsel %vm213_vm0, %v774_v40, %v2207_v39 }
 0x130   : > { %1731 = vmatpush.msk.msra.mxu0 %vm238_vm6, %v777_v42  ;;  %1733 = vmatpush.msk.msra.mxu1 %vm238_vm6, %v778_v44 }
 0x131   : > { %1732 = vmatmul.msk.f32.vlgmr.msra.gmra.mxu0 %vm234_vm7, %v1730_v41  ;;  %1734 = vmatmul.msk.f32.vlgmr.msra.gmra.mxu1 %vm234_vm7, %v1730_v41 }
 0x186   : > { %v260_v45 = vpop.f32.mrf.mxu0  ;;  %v280_v46 = vpop.f32.mrf.mxu1 }
 0x187   : > { %v311_v53 = vadd.f32 %v310_v47, %v260_v45  ;;  %v331_v54 = vadd.f32 %v330_v48, %v280_v46 }
 0x18e   : > { %v369_v50 = vpop.f32.mrf.mxu0  ;;  %v389_v52 = vpop.f32.mrf.mxu1 }
 0x18f   : > { %v392_v61 = vadd.f32 %v369_v50, %v311_v53  ;;  %v393_v62 = vadd.f32 %v389_v52, %v331_v54 }
 0x195   : > { %v449_v55 = vpop.f32.mrf.mxu2  ;;  %v469_v57 = vpop.f32.mrf.mxu3 }
 0x196   : > { %v524_v59 = vpop.f32.mrf.mxu0  ;;  %v544_v60 = vpop.f32.mrf.mxu1  ;;  %v472_v63 = vadd.f32 %v449_v55, %v392_v61  ;;  %v473_v0 = vadd.f32 %v469_v57, %v393_v62 }
 0x198   : > { %v547_v3 = vadd.f32 %v524_v59, %v472_v63  ;;  %v548_v4 = vadd.f32 %v544_v60, %v473_v0 }
 0x1a4   : > { %v597_v1 = vpop.f32.mrf.mxu2  ;;  %v617_v2 = vpop.f32.mrf.mxu3 }
 0x1a5   : > { %v620_v8 = vadd.f32 %v597_v1, %v547_v3  ;;  %v621_v9 = vadd.f32 %v617_v2, %v548_v4 }
 0x1a6   : > { %v670_v5 = vpop.f32.mrf.mxu0  ;;  %v690_v6 = vpop.f32.mrf.mxu1 }
 0x1a7   : > { %v693_v10 = vadd.f32 %v670_v5, %v620_v8  ;;  %v694_v11 = vadd.f32 %v690_v6, %v621_v9 }
 0x1ad   : > { %v730_v12 = vpop.f32.mrf.mxu2  ;;  %v750_v16 = vpop.f32.mrf.mxu3 }
 0x1ae   : > { %v753_v17 = vadd.f32 %v730_v12, %v693_v10  ;;  %v754_v18 = vadd.f32 %v750_v16, %v694_v11  ;;  %v803_v21 = vpop.f32.mrf.mxu0  ;;  %v823_v22 = vpop.f32.mrf.mxu1 }
 0x1b0   : > { %v826_v23 = vadd.f32 %v803_v21, %v753_v17  ;;  %v827_v27 = vadd.f32 %v823_v22, %v754_v18 }
 0x1b2   : > { %v828_v29 = vsel %vm238_vm6, %v826_v23, 0.0  ;;  %v829_v30 = vsel %vm238_vm6, %v827_v27, 0.0  ;;  %v834_v33 = vmul.f32 %v826_v23, %v826_v23  ;;  %v835_v34 = vmul.f32 %v827_v27, %v827_v27 }
 0x1b3   : > { %v830_v35 = vadd.f32 %v829_v30, %v828_v29 }
 0x1b4   : > { %v836_v36 = vsel %vm238_vm6, %v834_v33, 0.0  ;;  %v837_v40 = vsel %vm238_vm6, %v835_v34, 0.0 }
 0x1b5   : > { %831 = vadd.xlane.f32.xlu0 %v830_v35  ;;  %v838_v41 = vadd.f32 %v837_v40, %v836_v36 }
 0x1b7   : > { %839 = vadd.xlane.f32.xlu1 %v838_v41 }
 0x228   : > { %v832_v42 = vpop.xlane.xlu0 %831 }
 0x229   : > { %v833_v44 = vmul.f32 0.00390625, %v832_v42 }
 0x22a   : > { %v840_v45 = vpop.xlane.xlu1 %839 }
 0x22b   : > { %v841_v46 = vmul.f32 0.00390625, %v840_v45  ;;  %v842_v47 = vmul.f32 %v833_v44, %v833_v44  ;;  %v844_v60 = vsub.f32 %v826_v23, %v833_v44  ;;  %v845_v61 = vsub.f32 %v827_v27, %v833_v44 }
 0x22d   : > { %v843_v48 = vsub.f32 %v841_v46, %v842_v47 }
 0x22f   : > { %v846_v50 = vadd.f32 1e-05, %v843_v48 }
 0x231   : > { %1838 = vrsqrt.f32 %v846_v50  ;;  %vm853_vm11 = vweird.f32 %v846_v50 }
 0x237   : > { %v1839_v52 = vpop.eup %1838 }
 0x238   : > { %v848_v53 = vmul.f32 %v1839_v52, %v846_v50  ;;  %vm854_vm10 = vweird.f32 %v1839_v52 }
 0x239   : > { %vm855_vm12 = vmor %vm853_vm11, %vm854_vm10 }
 0x23a   : > { %v849_v54 = vmul.f32 %v1839_v52, %v848_v53 }
 0x23c   : > { %v850_v55 = vmul.f32 0.5, %v849_v54 }
 0x23e   : > { %v851_v57 = vsub.f32 1.5, %v850_v55 }
 0x240   : > { %v852_v59 = vmul.f32 %v1839_v52, %v851_v57 }
 0x242   : > { %v856_v62 = vsel %vm855_vm12, %v1839_v52, %v852_v59 }
 0x243   : > { %v2223_v63 = vmul.f32 %v856_v62, %v844_v60  ;;  %v2225_v0 = vmul.f32 %v856_v62, %v845_v61 }
 0x245   : > { %v2228_v1 = vmul.f32 0.70710677, %v2223_v63  ;;  %v2231_v2 = vmul.f32 0.70710677, %v2225_v0 }
 0x247   : > { %v863_v3 = vmul.f32 %v2228_v1, %v2228_v1  ;;  %v903_v4 = vmul.f32 %v2231_v2, %v2231_v2 }
 0x249   : > { %v864_v5 = vmin.f32 %v863_v3, 16.0  ;;  %v904_v6 = vmin.f32 %v903_v4, 16.0 }
 0x24b   : > { %v865_v8 = vmul.f32 2.1237322e-06, %v864_v5  ;;  %v876_v9 = vmul.f32 3.8918573e-05, %v864_v5  ;;  %v905_v10 = vmul.f32 2.1237322e-06, %v904_v6 }
 0x24c   : > { %v916_v11 = vmul.f32 3.8918573e-05, %v904_v6 }
 0x24d   : > { %v866_v12 = vadd.f32 0.00028619796, %v865_v8  ;;  %v877_v16 = vadd.f32 0.001143296, %v876_v9  ;;  %v906_v17 = vadd.f32 0.00028619796, %v905_v10 }
 0x24e   : > { %v917_v18 = vadd.f32 0.001143296, %v916_v11 }
 0x24f   : > { %v867_v21 = vmul.f32 %v866_v12, %v864_v5  ;;  %v878_v22 = vmul.f32 %v877_v16, %v864_v5  ;;  %v907_v23 = vmul.f32 %v906_v17, %v904_v6 }
 0x250   : > { %v918_v27 = vmul.f32 %v917_v18, %v904_v6 }
 0x251   : > { %v868_v29 = vadd.f32 0.0036580483, %v867_v21  ;;  %v879_v30 = vadd.f32 0.014752088, %v878_v22  ;;  %v908_v35 = vadd.f32 0.0036580483, %v907_v23 }
 0x252   : > { %v919_v33 = vadd.f32 0.014752088, %v918_v27 }
 0x253   : > { %v880_v34 = vmul.f32 %v879_v30, %v864_v5  ;;  %v869_v40 = vmul.f32 %v868_v29, %v864_v5  ;;  %v909_v45 = vmul.f32 %v908_v35, %v904_v6 }
 0x254   : > { %v920_v36 = vmul.f32 %v919_v33, %v904_v6 }
 0x255   : > { %v881_v41 = vadd.f32 0.112945676, %v880_v34  ;;  %v870_v47 = vadd.f32 0.05243302, %v869_v40  ;;  %v910_v53 = vadd.f32 0.05243302, %v909_v45 }
 0x256   : > { %v921_v42 = vadd.f32 0.112945676, %v920_v36 }
 0x257   : > { %v882_v44 = vmul.f32 %v881_v41, %v864_v5  ;;  %v871_v55 = vmul.f32 %v870_v47, %v864_v5  ;;  %v911_v60 = vmul.f32 %v910_v53, %v904_v6  ;;  %v860_v53 = vmul.f32 0.5, %v2225_v0 }
 0x258   : > { %v922_v46 = vmul.f32 %v921_v42, %v904_v6 }
 0x259   : > { %v883_v48 = vadd.f32 0.4994258, %v882_v44  ;;  %v872_v61 = vadd.f32 0.18741608, %v871_v55  ;;  %v912_v62 = vadd.f32 0.18741608, %v911_v60 }
 0x25a   : > { %v923_v50 = vadd.f32 0.4994258, %v922_v46 }
 0x25b   : > { %v884_v52 = vmul.f32 %v883_v48, %v864_v5  ;;  %v873_v4 = vmul.f32 %v872_v61, %v864_v5  ;;  %v913_v10 = vmul.f32 %v912_v62, %v904_v6 }
 0x25c   : > { %v924_v54 = vmul.f32 %v923_v50, %v904_v6  ;;  %v859_v50 = vmul.f32 0.5, %v2223_v63 }
 0x25d   : > { %v885_v57 = vadd.f32 1.0, %v884_v52  ;;  %v874_v16 = vadd.f32 1.1283791, %v873_v4  ;;  %v914_v27 = vadd.f32 1.1283791, %v913_v10 }
 0x25e   : > { %v925_v59 = vadd.f32 1.0, %v924_v54  ;;  %v1751_v10 = vld [vmem:[%s2413_s2 + $0x8] sm:$0xf] }
 0x25f   : > { %1840 = vrcp.f32 %v885_v57  ;;  %v897_v17 = vand.u32 2147483648, %v885_v57  ;;  %v895_v22 = vand.u32 2147483647, %v885_v57  ;;  %vm891_vm15 = vweird.f32 %v885_v57 }
 0x260   : > { %1842 = vrcp.f32 %v925_v59  ;;  %v937_v23 = vand.u32 2147483648, %v925_v59  ;;  %v935_v30 = vand.u32 2147483647, %v925_v59  ;;  %vm931_vm11 = vweird.f32 %v925_v59 }
 0x261   : > { %v898_v5 = vor.u32 1.1754944e-38, %v897_v17  ;;  %v875_v6 = vmul.f32 %v874_v16, %v2228_v1  ;;  %vm896_vm12 = vcmp.eq.f32.partialorder %v895_v22, 8.507059e+37  ;;  %v915_v41 = vmul.f32 %v914_v27, %v2231_v2  ;;  %v1756_v16 = vld [vmem:[%s2413_s2 + $0xc] sm:$0xf] }
 0x262   : > { %v938_v36 = vor.u32 1.1754944e-38, %v937_v23  ;;  %vm936_vm2 = vcmp.eq.f32.partialorder %v935_v30, 8.507059e+37 }
 0x265   : > { %v1841_v3 = vpop.eup %1840 }
 0x266   : > { %v1843_v8 = vpop.eup %1842  ;;  %v887_v9 = vmul.f32 %v1841_v3, %v885_v57  ;;  %vm892_vm13 = vweird.f32 %v1841_v3 }
 0x267   : > { %v927_v11 = vmul.f32 %v1843_v8, %v925_v59  ;;  %vm932_vm14 = vweird.f32 %v1843_v8  ;;  %vm893_vm10 = vmor %vm891_vm15, %vm892_vm13 }
 0x268   : > { %v888_v12 = vsub.f32 1.0, %v887_v9  ;;  %vm933_vm9 = vmor %vm931_vm11, %vm932_vm14 }
 0x269   : > { %v928_v18 = vsub.f32 1.0, %v927_v11 }
 0x26a   : > { %v889_v21 = vmul.f32 %v1841_v3, %v888_v12 }
 0x26b   : > { %v929_v29 = vmul.f32 %v1843_v8, %v928_v18 }
 0x26c   : > { %v890_v33 = vadd.f32 %v1841_v3, %v889_v21 }
 0x26d   : > { %v930_v34 = vadd.f32 %v1843_v8, %v929_v29 }
 0x26e   : > { %v894_v35 = vsel %vm893_vm10, %v1841_v3, %v890_v33  ;;  %v1766_v33 = vld [vmem:[%s2413_s2 + $0x18] sm:$0xf] }
 0x26f   : > { %v899_v40 = vsel %vm896_vm12, %v898_v5, %v894_v35  ;;  %v934_v42 = vsel %vm933_vm9, %v1843_v8, %v930_v34  ;;  %v1761_v35 = vld [vmem:[%s2413_s2 + $0x14] sm:$0xf] }
 0x270   : > { %v900_v44 = vmul.f32 %v899_v40, %v875_v6  ;;  %v939_v45 = vsel %vm936_vm2, %v938_v36, %v934_v42  ;;  %v1776_v40 = vld [vmem:[%s2413_s2 + $0x20] sm:$0xf]  ;;  %vm2422_vm2 = vcmask 916480   ;;  %v1771_v42 = vld [vmem:[%s2413_s2 + $0x1c] sm:$0xf] }
 0x271   : > { %v940_v46 = vmul.f32 %v939_v45, %v915_v41 }
 0x272   : > { %v1735_v47 = vclamps-f32 %v900_v44, 1.0 }
 0x273   : > { %v1736_v48 = vclamps-f32 %v940_v46, 1.0 }
 0x274   : > { %v943_v52 = vadd.f32 1.0, %v1735_v47 }
 0x275   : > { %v944_v1 = vadd.f32 1.0, %v1736_v48 }
 0x276   : > { %v945_v54 = vmul.f32 %v943_v52, %v859_v50 }
 0x277   : > { %v946_v55 = vmul.f32 %v944_v1, %v860_v53 }
 0x278   : > { %1058 = vrot.lane.b32.xlu2 %v945_v54, %s1921_s22  ;;  %1742 = vmatpush.msk.msrb.mxu0 %vm238_vm6, %v945_v54  ;;  %v1113_v2 = vmul.f32 %v945_v54, %v2055_v20  ;;  %v1235_v63 = vmul.f32 %v945_v54, %v2066_v25  ;;  %v1414_v0 = vmul.f32 %v945_v54, %v2094_v37 }
 0x279   : > { %1744 = vmatpush.msk.msrb.mxu1 %vm238_vm6, %v946_v55  ;;  %v1114_v57 = vmul.f32 %v946_v55, %v2050_v19  ;;  %v949_v20 = vmul.f32 %v945_v54, %v2042_v15  ;;  %v1415_v19 = vmul.f32 %v946_v55, %v2109_v43  ;;  %v950_v59 = vmul.f32 %v946_v55, %v2038_v14 }
 0x27a   : > { %1119 = vrot.lane.b32.xlu0 %v1113_v2, %s1918_s14  ;;  %v1174_v25 = vmul.f32 %v945_v54, %v2070_v26  ;;  %v1175_v37 = vmul.f32 %v946_v55, %v2063_v24  ;;  %v1296_v15 = vmul.f32 %v945_v54, %v2081_v31  ;;  %v1297_v43 = vmul.f32 %v946_v55, %v2098_v38  ;;  %v1737_v24 = vld [vmem:[%s2413_s2 + $0x10] sm:$0xf] }
 0x27b   : > { %1121 = vrot.lane.b32.xlu1 %v1114_v57, %s1918_s14  ;;  %v1236_v14 = vmul.f32 %v946_v55, %v2085_v32  ;;  %1743 = vmatmul.msk.f32.vlgmr.msrb.gmra.mxu0 %vm234_vm7, %v1737_v24  ;;  %v951_v32 = vld [vmem:[%s2413_s2] sm:$0xf]  ;;  %s188_s14 = sand.u32 1, %s1904_s16  }
 0x27c   : > { %1745 = vmatmul.msk.f32.vlgmr.msrb.gmra.mxu1 %vm234_vm7, %v1737_v24 }
 0x280   : > { %1060 = vrot.lane.b32.xlu2 %v946_v55, %s1921_s22 }
 0x282   : > { %1241 = vrot.lane.b32.xlu0 %v1235_v63, %s1916_s7 }
 0x283   : > { %1420 = vrot.lane.b32.xlu1 %v1414_v0, %s1915_s6 }
 0x288   : > { %954 = vrot.lane.b32.xlu2 %v949_v20, %s1919_s20 }
 0x28a   : > { %1422 = vrot.lane.b32.xlu0 %v1415_v19, %s1915_s6 }
 0x28b   : > { %1361 = vrot.lane.b32.xlu1 %v946_v55, %s1922_s23 }
 0x290   : > { %956 = vrot.lane.b32.xlu2 %v950_v59, %s1919_s20 }
 0x298   : > { %1180 = vrot.lane.b32.xlu2 %v1174_v25, %s1917_s13 }
 0x2a0   : > { %1182 = vrot.lane.b32.xlu2 %v1175_v37, %s1917_s13  ;;  %s1789_s13 = sshll.u32 %s1969_s19, 3  ;;  %s1608_s19 = scalar_lea.sflag [#allocation3], %s188_s14 }
 0x2a1   : > { %s1619_s22 = scalar_lea.hbm %s2415_s4, %s1789_s13 }
 0x2a2   : > { %s1623_s28 = sshll.u32 %s1619_s22, 4  ;;  %s1624_s28 = int_to_ptr.hbm [resolvable:$true] %s1623_s28 }
 0x2a3   : > { %s1864_s29 = sshra.s32 %s1624_s28, 4  ;;  %s1865_s29 = int_to_ptr.hbm [resolvable:$true] %s1864_s29 }
 0x2a4   : > { %s1866_s30 = scalar_lea.hbm %s1865_s29, 8  ;;  %p1871_p0 = scmp.lt.s32.totalorder %s1865_s29, %s2415_s4 }
 0x2a5   : > { %p1867_p11 = scmp.ne.s32.totalorder %s1865_s29, %s1866_s30  ;;  %p1872_p1 = scmp.lt.s32.totalorder %s1870_s10, %s1866_s30 }
 0x2a7   : > { %p1868_p12 = pnand %p1867_p11, %p1986_p5  ;;  %p1873_p2 = por %p1872_p1, %p1871_p0 }
 0x2a8   : > { %1302 = vrot.lane.b32.xlu2 %v1296_v15, %s1914_s5 }
 0x2a9   : > { %p1869_p13 = pneg %p1868_p12 }
 0x2ab   : > { %p1874_p3 = pnand %p1873_p2, %p1869_p13 }
 0x2b0   : > { %1304 = vrot.lane.b32.xlu2 %v1297_v43, %s1914_s5  ;;  %s1687_s5 = sshll.u32 %s188_s14, 3 }
 0x2b8   : > { %1243 = vrot.lane.b32.xlu2 %v1236_v14, %s1916_s7 }
 0x2c0   : > { %1359 = vrot.lane.b32.xlu2 %v945_v54, %s1922_s23  ;;  %s190_s23 = scalar_lea.vmem [#allocation2], %s1687_s5 }
 0x2c1   : > { %s1621_s27 = sshll.u32 %s190_s23, 4  ;;  %s1622_s27 = int_to_ptr.vmem [resolvable:$true] %s1621_s27 }
 0x2d2   : > { %v1059_v26 = vpop.permute.xlu2 %1058 }
 0x2d3   : > { %v1062_v61 = vsel %vm342_vm8, %v2116_v49, %v1059_v26 }
 0x2da   : > { %v1061_v60 = vpop.permute.xlu2 %1060 }
 0x2db   : > { %v1063_v4 = vsel %vm342_vm8, %v1059_v26, %v1061_v60 }
 0x2e2   : > { %v955_v31 = vpop.permute.xlu2 %954 }
 0x2e3   : > { %v958_v38 = vsel %vm231_vm5, %v2127_v56, %v955_v31  ;;  %v1746_v56 = vld [vmem:[%s2413_s2 + $0x4] sm:$0xf] }
 0x2e4   : > { %1738 = vmatpush.msk.msra.mxu2 %vm238_vm6, %v958_v38 }
 0x2e5   : > { %1739 = vmatmul.msk.f32.vlgmr.msra.gmra.mxu2 %vm234_vm7, %v951_v32 }
 0x2e6   : > { %1747 = vmatpush.msk.msrb.mxu2 %vm238_vm6, %v1062_v61 }
 0x2ea   : > { %v957_v62 = vpop.permute.xlu2 %956 }
 0x2eb   : > { %v959_v3 = vsel %vm231_vm5, %v955_v31, %v957_v62 }
 0x2ec   : > { %v1120_v8 = vpop.permute.xlu0 %1119  ;;  %1740 = vmatpush.msk.msra.mxu3 %vm238_vm6, %v959_v3 }
 0x2ed   : > { %v1122_v9 = vpop.permute.xlu1 %1121  ;;  %v1123_v49 = vsel %vm422_vm4, %v2129_v58, %v1120_v8  ;;  %1741 = vmatmul.msk.f32.vlgmr.msra.gmra.mxu3 %vm234_vm7, %v951_v32  ;;  %1748 = vmatmul.msk.f32.vlgmr.msrb.gmra.mxu2 %vm234_vm7, %v1746_v56 }
 0x2ee   : > { %1749 = vmatpush.msk.msrb.mxu3 %vm238_vm6, %v1063_v4  ;;  %v1124_v11 = vsel %vm422_vm4, %v1120_v8, %v1122_v9  ;;  %1752 = vmatpush.msk.msra.mxu0 %vm238_vm6, %v1123_v49 }
 0x2ef   : > { %1754 = vmatpush.msk.msra.mxu1 %vm238_vm6, %v1124_v11  ;;  %1753 = vmatmul.msk.f32.vlgmr.msra.gmra.mxu0 %vm234_vm7, %v1751_v10 }
 0x2f0   : > { %1755 = vmatmul.msk.f32.vlgmr.msra.gmra.mxu1 %vm234_vm7, %v1751_v10 }
 0x2f2   : > { %v1181_v58 = vpop.permute.xlu2 %1180 }
 0x2f3   : > { %v1184_v12 = vsel %vm497_vm3, %v2155_v7, %v1181_v58 }
 0x2f4   : > { %1757 = vmatpush.msk.msra.mxu2 %vm238_vm6, %v1184_v12  ;;  %v1242_v21 = vpop.permute.xlu0 %1241 }
 0x2f5   : > { %1750 = vmatmul.msk.f32.vlgmr.msrb.gmra.mxu3 %vm234_vm7, %v1746_v56  ;;  %1758 = vmatmul.msk.f32.vlgmr.msra.gmra.mxu2 %vm234_vm7, %v1756_v16  ;;  %v1421_v7 = vpop.permute.xlu1 %1420 }
 0x2f8   : > { %v1033_v48 = vpop.f32.mrf.mxu0 }
 0x2f9   : > { %v1053_v50 = vpop.f32.mrf.mxu1 }
 0x2fa   : > { %v1183_v17 = vpop.permute.xlu2 %1182 }
 0x2fb   : > { %v1185_v18 = vsel %vm497_vm3, %v1181_v58, %v1183_v17  ;;  %vm2423_vm3 = vmmov %vm2422_vm2 }
 0x2fc   : > { %1759 = vmatpush.msk.msra.mxu3 %vm238_vm6, %v1185_v18  ;;  %v1423_v23 = vpop.permute.xlu0 %1422 }
 0x2fd   : > { %1760 = vmatmul.msk.f32.vlgmr.msra.gmra.mxu3 %vm234_vm7, %v1756_v16  ;;  %v1424_v5 = vsel %vm213_vm0, %v1421_v7, %v1423_v23  ;;  %v1425_v34 = vsel %vm213_vm0, %v1423_v23, %v2207_v39 }
 0x302   : > { %v1303_v22 = vpop.permute.xlu2 %1302 }
 0x30a   : > { %v1305_v27 = vpop.permute.xlu2 %1304 }
 0x30b   : > { %v1306_v29 = vsel %vm403_vm1, %v1303_v22, %v1305_v27  ;;  %v1307_v30 = vsel %vm403_vm1, %v1305_v27, %v2190_v28  ;;  %v1362_v28 = vpop.permute.xlu1 %1361  ;;  %vm2420_vm1 = vcmask 1039360  }
 0x30c   : > { %1767 = vmatpush.msk.msrb.mxu2 %vm238_vm6, %v1306_v29  ;;  %1769 = vmatpush.msk.msrb.mxu3 %vm238_vm6, %v1307_v30  ;;  %vm2421_vm0 = vmmov %vm2420_vm1  ;;  %v1364_v41 = vsel %vm2422_vm2, %v1362_v28, %v2125_v51 }
 0x30d   : > { %1768 = vmatmul.msk.f32.vlgmr.msrb.gmra.mxu2 %vm234_vm7, %v1766_v33  ;;  %1770 = vmatmul.msk.f32.vlgmr.msrb.gmra.mxu3 %vm234_vm7, %v1766_v33 }
 0x30e   : > { %1777 = vmatpush.msk.msra.mxu2 %vm238_vm6, %v1424_v5  ;;  %1779 = vmatpush.msk.msra.mxu3 %vm238_vm6, %v1425_v34 }
 0x312   : > { %v1244_v6 = vpop.permute.xlu2 %1243 }
 0x313   : > { %v1245_v39 = vsel %vm2420_vm1, %v1242_v21, %v1244_v6  ;;  %v1246_v36 = vsel %vm2421_vm0, %v1244_v6, %v2173_v13 }
 0x314   : > { %1762 = vmatpush.msk.msrb.mxu0 %vm238_vm6, %v1245_v39  ;;  %1764 = vmatpush.msk.msrb.mxu1 %vm238_vm6, %v1246_v36 }
 0x315   : > { %1763 = vmatmul.msk.f32.vlgmr.msrb.gmra.mxu0 %vm234_vm7, %v1761_v35  ;;  %1765 = vmatmul.msk.f32.vlgmr.msrb.gmra.mxu1 %vm234_vm7, %v1761_v35 }
 0x316   : > { %1774 = vmatpush.msk.msra.mxu1 %vm238_vm6, %v1364_v41  ;;  %1778 = vmatmul.msk.f32.vlgmr.msra.gmra.mxu2 %vm234_vm7, %v1776_v40 }
 0x317   : > { %1780 = vmatmul.msk.f32.vlgmr.msra.gmra.mxu3 %vm234_vm7, %v1776_v40 }
 0x31a   : > { %v1360_v13 = vpop.permute.xlu2 %1359 }
 0x31b   : > { %v1363_v44 = vsel %vm2423_vm3, %v1360_v13, %v1362_v28 }
 0x31c   : > { %1772 = vmatpush.msk.msra.mxu0 %vm238_vm6, %v1363_v44 }
 0x31d   : > { %1773 = vmatmul.msk.f32.vlgmr.msra.gmra.mxu0 %vm234_vm7, %v1771_v42  ;;  %1775 = vmatmul.msk.f32.vlgmr.msra.gmra.mxu1 %vm234_vm7, %v1771_v42 }
 0x368   : > { %v984_v51 = vpop.f32.mrf.mxu2 }
 0x369   : > { %v1034_v52 = vadd.f32 %v1033_v48, %v984_v51 }
 0x36c   : > { %v1149_v55 = vpop.f32.mrf.mxu0 }
 0x36d   : > { %v1169_v2 = vpop.f32.mrf.mxu1 }
 0x370   : > { %v1004_v45 = vpop.f32.mrf.mxu3  ;;  %v1088_v46 = vpop.f32.mrf.mxu2 }
 0x371   : > { %v1054_v53 = vadd.f32 %v1053_v50, %v1004_v45  ;;  %v1111_v57 = vadd.f32 %v1088_v46, %v1034_v52 }
 0x373   : > { %v1172_v0 = vadd.f32 %v1149_v55, %v1111_v57 }
 0x378   : > { %v1108_v47 = vpop.f32.mrf.mxu3  ;;  %v1210_v1 = vpop.f32.mrf.mxu2 }
 0x379   : > { %v1112_v63 = vadd.f32 %v1108_v47, %v1054_v53  ;;  %v1233_v15 = vadd.f32 %v1210_v1, %v1172_v0 }
 0x37b   : > { %v1173_v20 = vadd.f32 %v1169_v2, %v1112_v63 }
 0x380   : > { %v1230_v54 = vpop.f32.mrf.mxu3 }
 0x381   : > { %v1234_v43 = vadd.f32 %v1230_v54, %v1173_v20 }
 0x390   : > { %v1332_v19 = vpop.f32.mrf.mxu2  ;;  %v1352_v59 = vpop.f32.mrf.mxu3 }
 0x392   : > { %v1271_v25 = vpop.f32.mrf.mxu0  ;;  %v1291_v37 = vpop.f32.mrf.mxu1 }
 0x393   : > { %v1294_v14 = vadd.f32 %v1271_v25, %v1233_v15  ;;  %v1295_v26 = vadd.f32 %v1291_v37, %v1234_v43 }
 0x395   : > { %v1355_v60 = vadd.f32 %v1332_v19, %v1294_v14  ;;  %v1356_v24 = vadd.f32 %v1352_v59, %v1295_v26 }
 0x399   : > { %v1450_v31 = vpop.f32.mrf.mxu2 }
 0x39a   : > { %v1389_v38 = vpop.f32.mrf.mxu0  ;;  %v1409_v32 = vpop.f32.mrf.mxu1 }
 0x39b   : > { %v1412_v61 = vadd.f32 %v1389_v38, %v1355_v60  ;;  %v1413_v62 = vadd.f32 %v1409_v32, %v1356_v24  ;;  %v1470_v3 = vpop.f32.mrf.mxu3 }
 0x39d   : > { %v1473_v4 = vadd.f32 %v1450_v31, %v1412_v61  ;;  %v1474_v8 = vadd.f32 %v1470_v3, %v1413_v62 }
 0x39f   : > { %v1475_v56 = vsel %vm238_vm6, %v1473_v4, 0.0  ;;  %v1476_v9 = vsel %vm238_vm6, %v1474_v8, 0.0  ;;  %v1481_v49 = vmul.f32 %v1473_v4, %v1473_v4  ;;  %v1482_v10 = vmul.f32 %v1474_v8, %v1474_v8 }
 0x3a0   : > { %v1477_v11 = vadd.f32 %v1476_v9, %v1475_v56 }
 0x3a1   : > { %v1483_v58 = vsel %vm238_vm6, %v1481_v49, 0.0  ;;  %v1484_v12 = vsel %vm238_vm6, %v1482_v10, 0.0 }
 0x3a2   : > { %1478 = vadd.xlane.f32.xlu0 %v1477_v11  ;;  %v1485_v16 = vadd.f32 %v1484_v12, %v1483_v58 }
 0x3a4   : > { %1486 = vadd.xlane.f32.xlu2 %v1485_v16 }
 0x415   : > { %v1479_v17 = vpop.xlane.xlu0 %1478 }
 0x416   : > { %v1480_v18 = vmul.f32 0.00390625, %v1479_v17 }
 0x417   : > { %v1487_v21 = vpop.xlane.xlu2 %1486 }
 0x418   : > { %v1488_v22 = vmul.f32 0.00390625, %v1487_v21  ;;  %v1489_v7 = vmul.f32 %v1480_v18, %v1480_v18  ;;  %v1491_v6 = vsub.f32 %v1473_v4, %v1480_v18  ;;  %v1492_v35 = vsub.f32 %v1474_v8, %v1480_v18 }
 0x41a   : > { %v1490_v23 = vsub.f32 %v1488_v22, %v1489_v7 }
 0x41c   : > { %v1493_v27 = vadd.f32 1e-05, %v1490_v23 }
 0x41e   : > { %1844 = vrsqrt.f32 %v1493_v27  ;;  %vm1500_vm5 = vweird.f32 %v1493_v27 }
 0x424   : > { %v1845_v29 = vpop.eup %1844 }
 0x425   : > { %v1495_v30 = vmul.f32 %v1845_v29, %v1493_v27  ;;  %vm1501_vm4 = vweird.f32 %v1845_v29 }
 0x426   : > { %vm1502_vm7 = vmor %vm1500_vm5, %vm1501_vm4 }
 0x427   : > { %v1496_v33 = vmul.f32 %v1845_v29, %v1495_v30 }
 0x429   : > { %v1497_v5 = vmul.f32 0.5, %v1496_v33 }
 0x42b   : > { %v1498_v34 = vsub.f32 1.5, %v1497_v5 }
 0x42d   : > { %v1499_v28 = vmul.f32 %v1845_v29, %v1498_v34 }
 0x42f   : > { %v1503_v39 = vsel %vm1502_vm7, %v1845_v29, %v1499_v28 }
 0x430   : > { %v2360_v36 = vmul.f32 %v1503_v39, %v1491_v6  ;;  %v2362_v40 = vmul.f32 %v1503_v39, %v1492_v35 }
 0x432   : > { %v2365_v41 = vmul.f32 0.70710677, %v2360_v36  ;;  %v2368_v13 = vmul.f32 0.70710677, %v2362_v40 }
 0x434   : > { %v1510_v42 = vmul.f32 %v2365_v41, %v2365_v41  ;;  %v1550_v44 = vmul.f32 %v2368_v13, %v2368_v13 }
 0x436   : > { %v1511_v51 = vmin.f32 %v1510_v42, 16.0  ;;  %v1551_v45 = vmin.f32 %v1550_v44, 16.0 }
 0x438   : > { %v1512_v46 = vmul.f32 2.1237322e-06, %v1511_v51  ;;  %v1552_v47 = vmul.f32 2.1237322e-06, %v1551_v45  ;;  %v1523_v48 = vmul.f32 3.8918573e-05, %v1511_v51 }
 0x439   : > { %v1563_v50 = vmul.f32 3.8918573e-05, %v1551_v45 }
 0x43a   : > { %v1513_v52 = vadd.f32 0.00028619796, %v1512_v46  ;;  %v1553_v53 = vadd.f32 0.00028619796, %v1552_v47  ;;  %v1524_v1 = vadd.f32 0.001143296, %v1523_v48 }
 0x43b   : > { %v1564_v54 = vadd.f32 0.001143296, %v1563_v50 }
 0x43c   : > { %v1514_v55 = vmul.f32 %v1513_v52, %v1511_v51  ;;  %v1554_v2 = vmul.f32 %v1553_v53, %v1551_v45  ;;  %v1525_v57 = vmul.f32 %v1524_v1, %v1511_v51 }
 0x43d   : > { %v1565_v63 = vmul.f32 %v1564_v54, %v1551_v45  ;;  %v1506_v54 = vmul.f32 0.5, %v2360_v36 }
 0x43e   : > { %v1515_v0 = vadd.f32 0.0036580483, %v1514_v55  ;;  %v1526_v20 = vadd.f32 0.014752088, %v1525_v57  ;;  %v1555_v59 = vadd.f32 0.0036580483, %v1554_v2 }
 0x43f   : > { %v1566_v19 = vadd.f32 0.014752088, %v1565_v63  ;;  %v1596_v2 = vld.sshfl [vmem:[#allocation1 + $0x8] sm:$0xff pattern:$0x75316420] }
 0x440   : > { %v1527_v25 = vmul.f32 %v1526_v20, %v1511_v51  ;;  %v1516_v15 = vmul.f32 %v1515_v0, %v1511_v51  ;;  %v1556_v26 = vmul.f32 %v1555_v59, %v1551_v45  ;;  %v1595_v63 = vld.sshfl [vmem:[#allocation1] sm:$0xff pattern:$0x75316420] }
 0x441   : > { %v1567_v37 = vmul.f32 %v1566_v19, %v1551_v45 }
 0x442   : > { %v1528_v43 = vadd.f32 0.112945676, %v1527_v25  ;;  %v1517_v31 = vadd.f32 0.05243302, %v1516_v15  ;;  %v1557_v61 = vadd.f32 0.05243302, %v1556_v26 }
 0x443   : > { %v1568_v14 = vadd.f32 0.112945676, %v1567_v37 }
 0x444   : > { %v1529_v60 = vmul.f32 %v1528_v43, %v1511_v51  ;;  %v1518_v4 = vmul.f32 %v1517_v31, %v1511_v51  ;;  %v1558_v9 = vmul.f32 %v1557_v61, %v1551_v45 }
 0x445   : > { %v1569_v24 = vmul.f32 %v1568_v14, %v1551_v45 }
 0x446   : > { %v1530_v38 = vadd.f32 0.4994258, %v1529_v60  ;;  %v1519_v49 = vadd.f32 0.18741608, %v1518_v4  ;;  %v1559_v10 = vadd.f32 0.18741608, %v1558_v9 }
 0x447   : > { %v1570_v32 = vadd.f32 0.4994258, %v1569_v24 }
 0x448   : > { %v1531_v62 = vmul.f32 %v1530_v38, %v1511_v51  ;;  %v1520_v58 = vmul.f32 %v1519_v49, %v1511_v51  ;;  %v1560_v17 = vmul.f32 %v1559_v10, %v1551_v45 }
 0x449   : > { %v1571_v3 = vmul.f32 %v1570_v32, %v1551_v45 }
 0x44a   : > { %v1532_v8 = vadd.f32 1.0, %v1531_v62  ;;  %v1521_v22 = vadd.f32 1.1283791, %v1520_v58  ;;  %v1561_v33 = vadd.f32 1.1283791, %v1560_v17 }
 0x44b   : > { %v1572_v56 = vadd.f32 1.0, %v1571_v3 }
 0x44c   : > { %1846 = vrcp.f32 %v1532_v8  ;;  %v1544_v7 = vand.u32 2147483648, %v1532_v8  ;;  %v1542_v29 = vand.u32 2147483647, %v1532_v8  ;;  %vm1538_vm13 = vweird.f32 %v1532_v8 }
 0x44d   : > { %1848 = vrcp.f32 %v1572_v56  ;;  %v1584_v30 = vand.u32 2147483648, %v1572_v56  ;;  %v1582_v34 = vand.u32 2147483647, %v1572_v56  ;;  %vm1578_vm15 = vweird.f32 %v1572_v56 }
 0x44e   : > { %v1545_v6 = vor.u32 1.1754944e-38, %v1544_v7  ;;  %v1522_v39 = vmul.f32 %v1521_v22, %v2365_v41  ;;  %vm1543_vm10 = vcmp.eq.f32.partialorder %v1542_v29, 8.507059e+37  ;;  %v1562_v51 = vmul.f32 %v1561_v33, %v2368_v13 }
 0x44f   : > { %v1585_v44 = vor.u32 1.1754944e-38, %v1584_v30  ;;  %vm1583_vm12 = vcmp.eq.f32.partialorder %v1582_v34, 8.507059e+37  ;;  %v1507_v41 = vmul.f32 0.5, %v2362_v40 }
 0x452   : > { %v1847_v11 = vpop.eup %1846 }
 0x453   : > { %v1849_v12 = vpop.eup %1848  ;;  %v1534_v16 = vmul.f32 %v1847_v11, %v1532_v8  ;;  %vm1539_vm8 = vweird.f32 %v1847_v11 }
 0x454   : > { %v1574_v18 = vmul.f32 %v1849_v12, %v1572_v56  ;;  %vm1579_vm9 = vweird.f32 %v1849_v12  ;;  %vm1540_vm14 = vmor %vm1538_vm13, %vm1539_vm8 }
 0x455   : > { %v1535_v21 = vsub.f32 1.0, %v1534_v16  ;;  %vm1580_vm11 = vmor %vm1578_vm15, %vm1579_vm9 }
 0x456   : > { %v1575_v23 = vsub.f32 1.0, %v1574_v18 }
 0x457   : > { %v1536_v27 = vmul.f32 %v1847_v11, %v1535_v21 }
 0x458   : > { %v1576_v5 = vmul.f32 %v1849_v12, %v1575_v23 }
 0x459   : > { %v1537_v28 = vadd.f32 %v1847_v11, %v1536_v27 }
 0x45a   : > { %v1577_v35 = vadd.f32 %v1849_v12, %v1576_v5 }
 0x45b   : > { %v1541_v42 = vsel %vm1540_vm14, %v1847_v11, %v1537_v28 }
 0x45c   : > { %v1546_v45 = vsel %vm1543_vm10, %v1545_v6, %v1541_v42  ;;  %v1581_v46 = vsel %vm1580_vm11, %v1849_v12, %v1577_v35 }
 0x45d   : > { %v1547_v47 = vmul.f32 %v1546_v45, %v1522_v39  ;;  %v1586_v48 = vsel %vm1583_vm12, %v1585_v44, %v1581_v46 }
 0x45e   : > { %v1587_v50 = vmul.f32 %v1586_v48, %v1562_v51 }
 0x45f   : > { %v1781_v52 = vclamps-f32 %v1547_v47, 1.0 }
 0x460   : > { %v1782_v53 = vclamps-f32 %v1587_v50, 1.0 }
 0x461   : > { %v1590_v1 = vadd.f32 1.0, %v1781_v52 }
 0x462   : > { %v1591_v55 = vadd.f32 1.0, %v1782_v53 }
 0x463   : > { %v1592_v13 = vmul.f32 %v1590_v1, %v1506_v54 }
 0x464   : > { %v1593_v57 = vmul.f32 %v1591_v55, %v1507_v41 }
 0x465   : > { %v1599_v20 = vadd.f32 %v1595_v63, %v1592_v13 }
 0x466   : > { %v1600_v0 = vadd.f32 %v1596_v2, %v1593_v57 }
 0x468   : > { %v1603_v19 = vrot.slane %v1600_v0, 4 }
 0x46a   : > { %v1604_v36 = vsel %vm238_vm6, %v1599_v20, %v1603_v19 }
 0x46b   : > { %1606 = vst [vmem:[%s190_s23] sm:$0xff] %v1604_v36 }
 0x46c   : > { %1877 = shalt.err (!%p1874_p3)
}
 0x46d   : > { %1790 = dma.vmem_to_hbm [thread:$0]  (%p1986_p5), %s1622_s27, 128, %s1624_s28, %s1608_s19  }
 0x46e PF: > { %p1796_p4 = scmp.ge.s32.totalorder %s1912_s18, 2  ;;  %s1635_s6 = sand.u32 1, %s1900_s15  }
 0x46f   : > { %s1636_s14 = scalar_lea.sflag [#allocation3], %s1635_s6 }
 0x470   : > { %p1793_p7 = pnand %p1796_p4, %p1990_p6 }
 0x472   : > { %p1794_p8 = pneg %p1793_p7 }
 0x474   : > { %1895 = dma.done.wait (%p1794_p8), %s1636_s14, 128  }
 0x475   : > { %1897 = vsyncadd (%p1794_p8), %s1636_s14, 4294967168  ;;  %p14_p9 = scmp.ge.s32.totalorder %s1973_s21, 4   ;;  %s2424_s15 = smov %s1904_s16 }
 0x476   : > { %s2425_s16 = smov %s1908_s17  ;;  %s2426_s17 = smov %s1984_s24 }
 0x477   : > { %s2427_s18 = smov %s1973_s21  ;;  %16 = sbr.rel (!%p14_p9) target bundleno = 3 (0x3), region = 88 }
 0x47c   :  { %1642 = vsyncpa [#allocation3], 1 }
 0x47d   :  { %1644 = vsyncpa [#allocation3 + $0x1], 1 }

</bundles_post_ra>
